<compile_context>
chip_gen: v7x
topology: tpu7x:2x2x1
jax: 0.10.0
libtpu: 0.0.40
codegen_flags: <defaults>
</compile_context>

<pallas_src>
import jax
import jax.numpy as jnp
from jax.experimental import pallas as pl
from jax.experimental.pallas import tpu as pltpu


def _mha_kernel(x_ref, wqkv_ref, bqkv_ref, wp_ref, bp_ref, o_ref, acc_ref):
    bblk, seq, emb = x_ref.shape           # (Bblk, N, E)
    num_heads, head_dim, _ = wp_ref.shape  # (H, D, E) -- un-padded head slabs
    rows = bblk * seq

    # Flatten the batch block into one wide row tile (free: leading-dim reshape).
    x = x_ref[...].reshape(rows, emb).astype(jnp.bfloat16)

    # Single fused, un-padded QKV projection (one MXU matmul per grid step).
    # 1/sqrt(E) scaling is already folded into the Q columns/bias host-side.
    qkv = jnp.dot(x, wqkv_ref[...], preferred_element_type=jnp.float32)
    qkv = (qkv + bqkv_ref[...]).astype(jnp.bfloat16)   # bf16 right after bias add
    qkv = qkv.reshape(bblk, seq, 3 * emb)              # leading-dim split: free

    acc_ref[...] = jnp.zeros_like(acc_ref)             # f32 output-proj accumulator

    for h in range(num_heads):                         # static, small H
        lo = h * head_dim
        q = qkv[:, :, lo:lo + head_dim]                        # (Bblk, N, D) bf16
        k = qkv[:, :, emb + lo:emb + lo + head_dim]
        v = qkv[:, :, 2 * emb + lo:2 * emb + lo + head_dim]

        # energy: 'bqd,bkd->bqk' (f32 accumulation)
        energy = jnp.einsum('bqd,bkd->bqk', q, k,
                            preferred_element_type=jnp.float32)

        # Numerically stable softmax; normalisation deferred past the P@V matmul.
        m = jnp.max(energy, axis=-1, keepdims=True)
        p = jnp.exp(energy - m)                         # f32, EUP
        s = jnp.sum(p, axis=-1, keepdims=True)          # f32

        o_h = jnp.einsum('bqk,bkd->bqd', p.astype(jnp.bfloat16), v,
                         preferred_element_type=jnp.float32)
        o_h = o_h * pl.reciprocal(s, approx=True)       # EUP reciprocal, VPU multiply

        # Fused head-merge + output projection (un-padded): acc += o_h @ Wp_slab[h]
        acc_ref[...] += jnp.dot(
            o_h.reshape(rows, head_dim).astype(jnp.bfloat16), wp_ref[h],
            preferred_element_type=jnp.float32)

    out = acc_ref[...] + bp_ref[...]                    # (rows, E) + (1, E)
    o_ref[...] = out.reshape(bblk, seq, emb).astype(o_ref.dtype)


def _tpu_generation_info():
    """(vmem_capacity_bytes, two_tensorcores?) with conservative fallbacks."""
    vmem = 64 * 2**20          # conservative default: v7x-like (64 MiB per TC)
    two_tc = True
    try:
        info = pltpu.get_tpu_info()
        vmem = int(getattr(info, "vmem_capacity_bytes", vmem))
        # v5e/v6e: 128 MiB VMEM, single TensorCore. v7x: 64 MiB per TC, 2 TCs.
        two_tc = vmem <= 64 * 2**20
    except Exception:
        pass
    return vmem, two_tc


def _vmem_estimate(bblk, seq, emb):
    """Rough per-step VMEM footprint in bytes."""
    rows = bblk * seq
    x_io = 2 * 2 * rows * emb * 4                 # x + out blocks, double-buffered f32
    qkv = rows * 3 * emb * (4 + 2)                # f32 projection result + bf16 copy
    acc = rows * emb * 4                          # VMEM scratch accumulator
    att = 3 * bblk * seq * seq * 4                # energy / p (+ slack), f32
    wts = 4 * emb * emb * 2 + 4 * emb * 4         # bf16 W_qkv + Wp slabs, f32 biases
    return x_io + qkv + acc + att + wts


def _choose_batch_block(batch, seq, emb, *, vmem_capacity, two_tc):
    """Batch elements per grid step.

    v5e/v6e (single TC, 128 MiB): as few, as large grid steps as the VMEM budget
    allows (every step costs fixed overhead; bigger rows = better MXU M tiles).
    v7x (2 TCs sharing the 'parallel' axis): prefer an even step count so neither
    core idles on the tail step. Always an exact divisor of `batch`.
    """
    budget = int(0.45 * vmem_capacity)
    divisors = [d for d in range(1, batch + 1) if batch % d == 0]
    fitting = [d for d in divisors if _vmem_estimate(d, seq, emb) <= budget] or [1]
    bblk = max(fitting)
    if two_tc:
        even = [d for d in fitting if (batch // d) % 2 == 0]
        if even:
            bblk = max(even)
    return bblk


def _prepare_params(params, *, num_heads):
    """Host-side glue: transpose nn.Linear weights, fuse Q/K/V into one un-padded
    (E, 3E) slab (1/sqrt(E) softmax scale folded into Q), split the output
    projection into un-padded per-head (D, E) slabs, cast MXU operands to bf16."""
    emb = params["wq"].shape[0]
    head_dim = emb // num_heads
    inv_scale = 1.0 / (emb ** 0.5)      # module scales energy by sqrt(emb_size)

    w_qkv = jnp.concatenate([params["wq"].T * inv_scale,
                             params["wk"].T,
                             params["wv"].T], axis=1).astype(jnp.bfloat16)  # (E, 3E)
    b_qkv = jnp.concatenate([params["bq"] * inv_scale,
                             params["bk"],
                             params["bv"]]).reshape(1, 3 * emb).astype(jnp.float32)

    # Output projection: rows of Wp^T grouped per head, un-padded (H, D, E).
    wp = params["wp"].T.reshape(num_heads, head_dim, emb).astype(jnp.bfloat16)
    bp = params["bp"].reshape(1, emb).astype(jnp.float32)
    return w_qkv, b_qkv, wp, bp


def multi_head_attention(x, params, *, num_heads):
    """x: (B, N, E) float32. params: dict of PyTorch-convention weights."""
    batch, seq, emb = x.shape
    assert emb % num_heads == 0

    w_qkv, b_qkv, wp, bp = _prepare_params(params, num_heads=num_heads)

    vmem_capacity, two_tc = _tpu_generation_info()
    bblk = _choose_batch_block(batch, seq, emb,
                               vmem_capacity=vmem_capacity, two_tc=two_tc)
    grid = (batch // bblk,)
    rows = bblk * seq

    est = _vmem_estimate(bblk, seq, emb)
    vmem_limit = int(max(32 * 2**20, min(int(0.85 * vmem_capacity), 4 * est)))

    def run(weight_mode):
        def w_spec(shape):
            kwargs = {} if weight_mode is None else {"pipeline_mode": weight_mode}
            return pl.BlockSpec(shape, lambda b: (0,) * len(shape), **kwargs)

        def full_spec(shape):
            return pl.BlockSpec(shape, lambda b: (0,) * len(shape))

        return pl.pallas_call(
            _mha_kernel,
            out_shape=jax.ShapeDtypeStruct((batch, seq, emb), x.dtype),
            grid_spec=pltpu.PrefetchScalarGridSpec(
                num_scalar_prefetch=0,
                grid=grid,
                in_specs=[
                    pl.BlockSpec((bblk, seq, emb), lambda b: (b, 0, 0)),   # x
                    w_spec(w_qkv.shape), full_spec(b_qkv.shape),           # fused QKV
                    w_spec(wp.shape), full_spec(bp.shape),                 # out proj
                ],
                out_specs=pl.BlockSpec((bblk, seq, emb), lambda b: (b, 0, 0)),
                scratch_shapes=[pltpu.VMEM((rows, emb), jnp.float32)],     # acc
            ),
            compiler_params=pltpu.CompilerParams(
                dimension_semantics=("parallel",),
                vmem_limit_bytes=vmem_limit,
            ),
        )(x, w_qkv, b_qkv, wp, bp)

    try:
        # Grid-invariant weights: single-buffer them (pure VMEM savings; the
        # constant index_map already implies no re-DMA between grid steps).
        return run(pl.Buffered(1))
    except Exception:
        # TODO(synk): the fallback only catches eagerly-raised errors; under an
        # outer jax.jit a lowering failure would surface later. Semantics are
        # identical either way (default double-buffering).
        return run(None)


def _init_params(key, emb_size):
    # Deterministic synthetic init (PyTorch-style uniform(-1/sqrt(E), 1/sqrt(E))).
    bound = 1.0 / (emb_size ** 0.5)
    keys = jax.random.split(key, 8)
    u = lambda k, shape: jax.random.uniform(k, shape, jnp.float32, -bound, bound)
    return {
        "wq": u(keys[0], (emb_size, emb_size)), "bq": u(keys[1], (emb_size,)),
        "wk": u(keys[2], (emb_size, emb_size)), "bk": u(keys[3], (emb_size,)),
        "wv": u(keys[4], (emb_size, emb_size)), "bv": u(keys[5], (emb_size,)),
        "wp": u(keys[6], (emb_size, emb_size)), "bp": u(keys[7], (emb_size,)),
    }


def _reference(x, params, *, num_heads):
    """Pure-JAX f32 reference reproducing the PyTorch forward (eval mode)."""
    B, N, E = x.shape
    D = E // num_heads
    q = x @ params["wq"].T + params["bq"]
    k = x @ params["wk"].T + params["bk"]
    v = x @ params["wv"].T + params["bv"]
    split = lambda t: t.reshape(B, N, num_heads, D).transpose(0, 2, 1, 3)  # b h n d
    q, k, v = split(q), split(k), split(v)
    energy = jnp.einsum("bhqd,bhkd->bhqk", q, k)
    att = jax.nn.softmax(energy / (E ** 0.5), axis=-1)
    out = jnp.einsum("bhal,bhlv->bhav", att, v)
    out = out.transpose(0, 2, 1, 3).reshape(B, N, E)
    return out @ params["wp"].T + params["bp"]


if __name__ == "__main__":
    B, N, E, H = 2, 8, 32, 4

    key = jax.random.PRNGKey(0)
    kx, kp = jax.random.split(key)
    x = jax.random.normal(kx, (B, N, E), jnp.float32)
    params = _init_params(kp, E)

    out = multi_head_attention(x, params, num_heads=H)
    out = jax.block_until_ready(out)

    ref = _reference(x, params, num_heads=H)
    assert out.shape == (B, N, E)
    err = jnp.max(jnp.abs(out - ref))
    # bf16 MXU operands (f32 accumulation / f32 softmax) -> ~1e-2 tolerance.
    assert jnp.allclose(out, ref, atol=2e-2, rtol=2e-2), f"max abs err {err}"

    print("KERNEL_OK")
</pallas_src>

<mosaic_0001>
module attributes {stable_mosaic.version = 11 : i64} {
  func.func @_mha_kernel(%arg0: i32, %arg1: memref<1x8x32xf32, #tpu.memory_space<vmem>>, %arg2: memref<32x96xbf16, #tpu.memory_space<vmem>>, %arg3: memref<1x96xf32, #tpu.memory_space<vmem>>, %arg4: memref<4x8x32xbf16, #tpu.memory_space<vmem>>, %arg5: memref<1x32xf32, #tpu.memory_space<vmem>>, %arg6: memref<1x8x32xf32, #tpu.memory_space<vmem>>, %arg7: memref<8x32xf32, #tpu.memory_space<vmem>>) attributes {dimension_semantics = [#tpu.dimension_semantics<parallel>], iteration_bounds = array<i64: 2>, scalar_prefetch = 0 : i64, scratch_operands = 1 : i64, tpu.core_type = #tpu.core_type<tc>, window_params = [{transform_indices = @transform_0, window_bounds = array<i64: 1, 8, 32>}, {pipeline_mode = #tpu.pipeline_mode<synchronous>, transform_indices = @transform_1, window_bounds = array<i64: 32, 96>}, {pipeline_mode = #tpu.pipeline_mode<synchronous>, transform_indices = @transform_2, window_bounds = array<i64: 1, 96>}, {pipeline_mode = #tpu.pipeline_mode<synchronous>, transform_indices = @transform_3, window_bounds = array<i64: 4, 8, 32>}, {pipeline_mode = #tpu.pipeline_mode<synchronous>, transform_indices = @transform_4, window_bounds = array<i64: 1, 32>}, {transform_indices = @transform_5, window_bounds = array<i64: 1, 8, 32>}]} {
    %c0 = arith.constant 0 : index
    %c0_0 = arith.constant 0 : index
    %c0_1 = arith.constant 0 : index
    %0 = vector.load %arg1[%c0, %c0_0, %c0_1] : memref<1x8x32xf32, #tpu.memory_space<vmem>>, vector<1x8x32xf32>
    %1 = vector.shape_cast %0 : vector<1x8x32xf32> to vector<8x32xf32>
    %2 = arith.truncf %1 : vector<8x32xf32> to vector<8x32xbf16>
    %c0_2 = arith.constant 0 : index
    %c0_3 = arith.constant 0 : index
    %3 = vector.load %arg2[%c0_2, %c0_3] : memref<32x96xbf16, #tpu.memory_space<vmem>>, vector<32x96xbf16>
    %cst = arith.constant dense<0.000000e+00> : vector<8x96xf32>
    %4 = tpu.matmul %2, %3, %cst {dimension_numbers = #tpu.dot_dimension_numbers<[1], [0], [0], [1], [0, 0, 1, 1], [], []>} : vector<8x32xbf16>, vector<32x96xbf16>, vector<8x96xf32> -> vector<8x96xf32>
    %c0_4 = arith.constant 0 : index
    %c0_5 = arith.constant 0 : index
    %5 = vector.load %arg3[%c0_4, %c0_5] : memref<1x96xf32, #tpu.memory_space<vmem>>, vector<1x96xf32>
    %6 = vector.broadcast %5 : vector<1x96xf32> to vector<8x96xf32>
    %7 = arith.addf %4, %6 : vector<8x96xf32>
    %8 = arith.truncf %7 : vector<8x96xf32> to vector<8x96xbf16>
    %9 = vector.shape_cast %8 : vector<8x96xbf16> to vector<1x8x96xbf16>
    %cst_6 = arith.constant 0.000000e+00 : f32
    %10 = vector.broadcast %cst_6 : f32 to vector<8x32xf32>
    %c0_7 = arith.constant 0 : index
    %c0_8 = arith.constant 0 : index
    %11 = vector.load %arg7[%c0_7, %c0_8] : memref<8x32xf32, #tpu.memory_space<vmem>>, vector<8x32xf32>
    tpu.vector_store %arg7[%c0_7, %c0_8], %10 {strides = array<i32>} : memref<8x32xf32, #tpu.memory_space<vmem>>, vector<8x32xf32>,
    %12 = vector.extract_strided_slice %9 {offsets = [0, 0, 0], sizes = [1, 8, 8], strides = [1, 1, 1]} : vector<1x8x96xbf16> to vector<1x8x8xbf16>
    %13 = vector.extract_strided_slice %9 {offsets = [0, 0, 32], sizes = [1, 8, 8], strides = [1, 1, 1]} : vector<1x8x96xbf16> to vector<1x8x8xbf16>
    %14 = vector.extract_strided_slice %9 {offsets = [0, 0, 64], sizes = [1, 8, 8], strides = [1, 1, 1]} : vector<1x8x96xbf16> to vector<1x8x8xbf16>
    "tpu.trace_start"() <{level = 10 : i32, message = "bqd,bkd->bqk"}> : () -> ()
    %cst_9 = arith.constant dense<0.000000e+00> : vector<1x8x8xf32>
    %15 = tpu.matmul %12, %13, %cst_9 {dimension_numbers = #tpu.dot_dimension_numbers<[2], [2], [1], [1], [0, 0, 0, 1, 1, 1], [0], [0]>} : vector<1x8x8xbf16>, vector<1x8x8xbf16>, vector<1x8x8xf32> -> vector<1x8x8xf32>
    "tpu.trace_stop"() : () -> ()
    %cst_10 = arith.constant dense<0xFF800000> : vector<1x8xf32>
    %16 = vector.multi_reduction <maximumf>, %15, %cst_10 [2] : vector<1x8x8xf32> to vector<1x8xf32>
    %17 = vector.shape_cast %16 : vector<1x8xf32> to vector<1x8x1xf32>
    %18 = vector.broadcast %17 : vector<1x8x1xf32> to vector<1x8x8xf32>
    %19 = arith.subf %15, %18 : vector<1x8x8xf32>
    %20 = math.exp %19 : vector<1x8x8xf32>
    %cst_11 = arith.constant dense<0.000000e+00> : vector<1x8xf32>
    %21 = vector.multi_reduction <add>, %20, %cst_11 [2] : vector<1x8x8xf32> to vector<1x8xf32>
    %22 = vector.shape_cast %21 : vector<1x8xf32> to vector<1x8x1xf32>
    %23 = arith.truncf %20 : vector<1x8x8xf32> to vector<1x8x8xbf16>
    "tpu.trace_start"() <{level = 10 : i32, message = "bqk,bkd->bqd"}> : () -> ()
    %cst_12 = arith.constant dense<0.000000e+00> : vector<1x8x8xf32>
    %24 = tpu.matmul %23, %14, %cst_12 {dimension_numbers = #tpu.dot_dimension_numbers<[2], [1], [1], [2], [0, 0, 0, 1, 1, 2], [0], [0]>} : vector<1x8x8xbf16>, vector<1x8x8xbf16>, vector<1x8x8xf32> -> vector<1x8x8xf32>
    "tpu.trace_stop"() : () -> ()
    %25 = tpu.reciprocal %22 {approx = true} : vector<1x8x1xf32> -> vector<1x8x1xf32>
    %26 = vector.broadcast %25 : vector<1x8x1xf32> to vector<1x8x8xf32>
    %27 = arith.mulf %24, %26 : vector<1x8x8xf32>
    %c0_13 = arith.constant 0 : index
    %c0_14 = arith.constant 0 : index
    %28 = vector.load %arg7[%c0_13, %c0_14] : memref<8x32xf32, #tpu.memory_space<vmem>>, vector<8x32xf32>
    %29 = vector.shape_cast %27 : vector<1x8x8xf32> to vector<8x8xf32>
    %30 = arith.truncf %29 : vector<8x8xf32> to vector<8x8xbf16>
    %c0_15 = arith.constant 0 : index
    %c0_16 = arith.constant 0 : index
    %c0_17 = arith.constant 0 : index
    %31 = vector.load %arg4[%c0_15, %c0_16, %c0_17] : memref<4x8x32xbf16, #tpu.memory_space<vmem>>, vector<1x8x32xbf16>
    %32 = vector.shape_cast %31 : vector<1x8x32xbf16> to vector<8x32xbf16>
    %cst_18 = arith.constant dense<0.000000e+00> : vector<8x32xf32>
    %33 = tpu.matmul %30, %32, %cst_18 {dimension_numbers = #tpu.dot_dimension_numbers<[1], [0], [0], [1], [0, 0, 1, 1], [], []>} : vector<8x8xbf16>, vector<8x32xbf16>, vector<8x32xf32> -> vector<8x32xf32>
    %34 = arith.addf %28, %33 : vector<8x32xf32>
    %c0_19 = arith.constant 0 : index
    %c0_20 = arith.constant 0 : index
    %35 = vector.load %arg7[%c0_19, %c0_20] : memref<8x32xf32, #tpu.memory_space<vmem>>, vector<8x32xf32>
    tpu.vector_store %arg7[%c0_19, %c0_20], %34 {strides = array<i32>} : memref<8x32xf32, #tpu.memory_space<vmem>>, vector<8x32xf32>,
    %36 = vector.extract_strided_slice %9 {offsets = [0, 0, 8], sizes = [1, 8, 8], strides = [1, 1, 1]} : vector<1x8x96xbf16> to vector<1x8x8xbf16>
    %37 = vector.extract_strided_slice %9 {offsets = [0, 0, 40], sizes = [1, 8, 8], strides = [1, 1, 1]} : vector<1x8x96xbf16> to vector<1x8x8xbf16>
    %38 = vector.extract_strided_slice %9 {offsets = [0, 0, 72], sizes = [1, 8, 8], strides = [1, 1, 1]} : vector<1x8x96xbf16> to vector<1x8x8xbf16>
    "tpu.trace_start"() <{level = 10 : i32, message = "bqd,bkd->bqk"}> : () -> ()
    %cst_21 = arith.constant dense<0.000000e+00> : vector<1x8x8xf32>
    %39 = tpu.matmul %36, %37, %cst_21 {dimension_numbers = #tpu.dot_dimension_numbers<[2], [2], [1], [1], [0, 0, 0, 1, 1, 1], [0], [0]>} : vector<1x8x8xbf16>, vector<1x8x8xbf16>, vector<1x8x8xf32> -> vector<1x8x8xf32>
    "tpu.trace_stop"() : () -> ()
    %cst_22 = arith.constant dense<0xFF800000> : vector<1x8xf32>
    %40 = vector.multi_reduction <maximumf>, %39, %cst_22 [2] : vector<1x8x8xf32> to vector<1x8xf32>
    %41 = vector.shape_cast %40 : vector<1x8xf32> to vector<1x8x1xf32>
    %42 = vector.broadcast %41 : vector<1x8x1xf32> to vector<1x8x8xf32>
    %43 = arith.subf %39, %42 : vector<1x8x8xf32>
    %44 = math.exp %43 : vector<1x8x8xf32>
    %cst_23 = arith.constant dense<0.000000e+00> : vector<1x8xf32>
    %45 = vector.multi_reduction <add>, %44, %cst_23 [2] : vector<1x8x8xf32> to vector<1x8xf32>
    %46 = vector.shape_cast %45 : vector<1x8xf32> to vector<1x8x1xf32>
    %47 = arith.truncf %44 : vector<1x8x8xf32> to vector<1x8x8xbf16>
    "tpu.trace_start"() <{level = 10 : i32, message = "bqk,bkd->bqd"}> : () -> ()
    %cst_24 = arith.constant dense<0.000000e+00> : vector<1x8x8xf32>
    %48 = tpu.matmul %47, %38, %cst_24 {dimension_numbers = #tpu.dot_dimension_numbers<[2], [1], [1], [2], [0, 0, 0, 1, 1, 2], [0], [0]>} : vector<1x8x8xbf16>, vector<1x8x8xbf16>, vector<1x8x8xf32> -> vector<1x8x8xf32>
    "tpu.trace_stop"() : () -> ()
    %49 = tpu.reciprocal %46 {approx = true} : vector<1x8x1xf32> -> vector<1x8x1xf32>
    %50 = vector.broadcast %49 : vector<1x8x1xf32> to vector<1x8x8xf32>
    %51 = arith.mulf %48, %50 : vector<1x8x8xf32>
    %c0_25 = arith.constant 0 : index
    %c0_26 = arith.constant 0 : index
    %52 = vector.load %arg7[%c0_25, %c0_26] : memref<8x32xf32, #tpu.memory_space<vmem>>, vector<8x32xf32>
    %53 = vector.shape_cast %51 : vector<1x8x8xf32> to vector<8x8xf32>
    %54 = arith.truncf %53 : vector<8x8xf32> to vector<8x8xbf16>
    %c1 = arith.constant 1 : index
    %c0_27 = arith.constant 0 : index
    %c0_28 = arith.constant 0 : index
    %55 = vector.load %arg4[%c1, %c0_27, %c0_28] : memref<4x8x32xbf16, #tpu.memory_space<vmem>>, vector<1x8x32xbf16>
    %56 = vector.shape_cast %55 : vector<1x8x32xbf16> to vector<8x32xbf16>
    %cst_29 = arith.constant dense<0.000000e+00> : vector<8x32xf32>
    %57 = tpu.matmul %54, %56, %cst_29 {dimension_numbers = #tpu.dot_dimension_numbers<[1], [0], [0], [1], [0, 0, 1, 1], [], []>} : vector<8x8xbf16>, vector<8x32xbf16>, vector<8x32xf32> -> vector<8x32xf32>
    %58 = arith.addf %52, %57 : vector<8x32xf32>
    %c0_30 = arith.constant 0 : index
    %c0_31 = arith.constant 0 : index
    %59 = vector.load %arg7[%c0_30, %c0_31] : memref<8x32xf32, #tpu.memory_space<vmem>>, vector<8x32xf32>
    tpu.vector_store %arg7[%c0_30, %c0_31], %58 {strides = array<i32>} : memref<8x32xf32, #tpu.memory_space<vmem>>, vector<8x32xf32>,
    %60 = vector.extract_strided_slice %9 {offsets = [0, 0, 16], sizes = [1, 8, 8], strides = [1, 1, 1]} : vector<1x8x96xbf16> to vector<1x8x8xbf16>
    %61 = vector.extract_strided_slice %9 {offsets = [0, 0, 48], sizes = [1, 8, 8], strides = [1, 1, 1]} : vector<1x8x96xbf16> to vector<1x8x8xbf16>
    %62 = vector.extract_strided_slice %9 {offsets = [0, 0, 80], sizes = [1, 8, 8], strides = [1, 1, 1]} : vector<1x8x96xbf16> to vector<1x8x8xbf16>
    "tpu.trace_start"() <{level = 10 : i32, message = "bqd,bkd->bqk"}> : () -> ()
    %cst_32 = arith.constant dense<0.000000e+00> : vector<1x8x8xf32>
    %63 = tpu.matmul %60, %61, %cst_32 {dimension_numbers = #tpu.dot_dimension_numbers<[2], [2], [1], [1], [0, 0, 0, 1, 1, 1], [0], [0]>} : vector<1x8x8xbf16>, vector<1x8x8xbf16>, vector<1x8x8xf32> -> vector<1x8x8xf32>
    "tpu.trace_stop"() : () -> ()
    %cst_33 = arith.constant dense<0xFF800000> : vector<1x8xf32>
    %64 = vector.multi_reduction <maximumf>, %63, %cst_33 [2] : vector<1x8x8xf32> to vector<1x8xf32>
    %65 = vector.shape_cast %64 : vector<1x8xf32> to vector<1x8x1xf32>
    %66 = vector.broadcast %65 : vector<1x8x1xf32> to vector<1x8x8xf32>
    %67 = arith.subf %63, %66 : vector<1x8x8xf32>
    %68 = math.exp %67 : vector<1x8x8xf32>
    %cst_34 = arith.constant dense<0.000000e+00> : vector<1x8xf32>
    %69 = vector.multi_reduction <add>, %68, %cst_34 [2] : vector<1x8x8xf32> to vector<1x8xf32>
    %70 = vector.shape_cast %69 : vector<1x8xf32> to vector<1x8x1xf32>
    %71 = arith.truncf %68 : vector<1x8x8xf32> to vector<1x8x8xbf16>
    "tpu.trace_start"() <{level = 10 : i32, message = "bqk,bkd->bqd"}> : () -> ()
    %cst_35 = arith.constant dense<0.000000e+00> : vector<1x8x8xf32>
    %72 = tpu.matmul %71, %62, %cst_35 {dimension_numbers = #tpu.dot_dimension_numbers<[2], [1], [1], [2], [0, 0, 0, 1, 1, 2], [0], [0]>} : vector<1x8x8xbf16>, vector<1x8x8xbf16>, vector<1x8x8xf32> -> vector<1x8x8xf32>
    "tpu.trace_stop"() : () -> ()
    %73 = tpu.reciprocal %70 {approx = true} : vector<1x8x1xf32> -> vector<1x8x1xf32>
    %74 = vector.broadcast %73 : vector<1x8x1xf32> to vector<1x8x8xf32>
    %75 = arith.mulf %72, %74 : vector<1x8x8xf32>
    %c0_36 = arith.constant 0 : index
    %c0_37 = arith.constant 0 : index
    %76 = vector.load %arg7[%c0_36, %c0_37] : memref<8x32xf32, #tpu.memory_space<vmem>>, vector<8x32xf32>
    %77 = vector.shape_cast %75 : vector<1x8x8xf32> to vector<8x8xf32>
    %78 = arith.truncf %77 : vector<8x8xf32> to vector<8x8xbf16>
    %c2 = arith.constant 2 : index
    %c0_38 = arith.constant 0 : index
    %c0_39 = arith.constant 0 : index
    %79 = vector.load %arg4[%c2, %c0_38, %c0_39] : memref<4x8x32xbf16, #tpu.memory_space<vmem>>, vector<1x8x32xbf16>
    %80 = vector.shape_cast %79 : vector<1x8x32xbf16> to vector<8x32xbf16>
    %cst_40 = arith.constant dense<0.000000e+00> : vector<8x32xf32>
    %81 = tpu.matmul %78, %80, %cst_40 {dimension_numbers = #tpu.dot_dimension_numbers<[1], [0], [0], [1], [0, 0, 1, 1], [], []>} : vector<8x8xbf16>, vector<8x32xbf16>, vector<8x32xf32> -> vector<8x32xf32>
    %82 = arith.addf %76, %81 : vector<8x32xf32>
    %c0_41 = arith.constant 0 : index
    %c0_42 = arith.constant 0 : index
    %83 = vector.load %arg7[%c0_41, %c0_42] : memref<8x32xf32, #tpu.memory_space<vmem>>, vector<8x32xf32>
    tpu.vector_store %arg7[%c0_41, %c0_42], %82 {strides = array<i32>} : memref<8x32xf32, #tpu.memory_space<vmem>>, vector<8x32xf32>,
    %84 = vector.extract_strided_slice %9 {offsets = [0, 0, 24], sizes = [1, 8, 8], strides = [1, 1, 1]} : vector<1x8x96xbf16> to vector<1x8x8xbf16>
    %85 = vector.extract_strided_slice %9 {offsets = [0, 0, 56], sizes = [1, 8, 8], strides = [1, 1, 1]} : vector<1x8x96xbf16> to vector<1x8x8xbf16>
    %86 = vector.extract_strided_slice %9 {offsets = [0, 0, 88], sizes = [1, 8, 8], strides = [1, 1, 1]} : vector<1x8x96xbf16> to vector<1x8x8xbf16>
    "tpu.trace_start"() <{level = 10 : i32, message = "bqd,bkd->bqk"}> : () -> ()
    %cst_43 = arith.constant dense<0.000000e+00> : vector<1x8x8xf32>
    %87 = tpu.matmul %84, %85, %cst_43 {dimension_numbers = #tpu.dot_dimension_numbers<[2], [2], [1], [1], [0, 0, 0, 1, 1, 1], [0], [0]>} : vector<1x8x8xbf16>, vector<1x8x8xbf16>, vector<1x8x8xf32> -> vector<1x8x8xf32>
    "tpu.trace_stop"() : () -> ()
    %cst_44 = arith.constant dense<0xFF800000> : vector<1x8xf32>
    %88 = vector.multi_reduction <maximumf>, %87, %cst_44 [2] : vector<1x8x8xf32> to vector<1x8xf32>
    %89 = vector.shape_cast %88 : vector<1x8xf32> to vector<1x8x1xf32>
    %90 = vector.broadcast %89 : vector<1x8x1xf32> to vector<1x8x8xf32>
    %91 = arith.subf %87, %90 : vector<1x8x8xf32>
    %92 = math.exp %91 : vector<1x8x8xf32>
    %cst_45 = arith.constant dense<0.000000e+00> : vector<1x8xf32>
    %93 = vector.multi_reduction <add>, %92, %cst_45 [2] : vector<1x8x8xf32> to vector<1x8xf32>
    %94 = vector.shape_cast %93 : vector<1x8xf32> to vector<1x8x1xf32>
    %95 = arith.truncf %92 : vector<1x8x8xf32> to vector<1x8x8xbf16>
    "tpu.trace_start"() <{level = 10 : i32, message = "bqk,bkd->bqd"}> : () -> ()
    %cst_46 = arith.constant dense<0.000000e+00> : vector<1x8x8xf32>
    %96 = tpu.matmul %95, %86, %cst_46 {dimension_numbers = #tpu.dot_dimension_numbers<[2], [1], [1], [2], [0, 0, 0, 1, 1, 2], [0], [0]>} : vector<1x8x8xbf16>, vector<1x8x8xbf16>, vector<1x8x8xf32> -> vector<1x8x8xf32>
    "tpu.trace_stop"() : () -> ()
    %97 = tpu.reciprocal %94 {approx = true} : vector<1x8x1xf32> -> vector<1x8x1xf32>
    %98 = vector.broadcast %97 : vector<1x8x1xf32> to vector<1x8x8xf32>
    %99 = arith.mulf %96, %98 : vector<1x8x8xf32>
    %c0_47 = arith.constant 0 : index
    %c0_48 = arith.constant 0 : index
    %100 = vector.load %arg7[%c0_47, %c0_48] : memref<8x32xf32, #tpu.memory_space<vmem>>, vector<8x32xf32>
    %101 = vector.shape_cast %99 : vector<1x8x8xf32> to vector<8x8xf32>
    %102 = arith.truncf %101 : vector<8x8xf32> to vector<8x8xbf16>
    %c3 = arith.constant 3 : index
    %c0_49 = arith.constant 0 : index
    %c0_50 = arith.constant 0 : index
    %103 = vector.load %arg4[%c3, %c0_49, %c0_50] : memref<4x8x32xbf16, #tpu.memory_space<vmem>>, vector<1x8x32xbf16>
    %104 = vector.shape_cast %103 : vector<1x8x32xbf16> to vector<8x32xbf16>
    %cst_51 = arith.constant dense<0.000000e+00> : vector<8x32xf32>
    %105 = tpu.matmul %102, %104, %cst_51 {dimension_numbers = #tpu.dot_dimension_numbers<[1], [0], [0], [1], [0, 0, 1, 1], [], []>} : vector<8x8xbf16>, vector<8x32xbf16>, vector<8x32xf32> -> vector<8x32xf32>
    %106 = arith.addf %100, %105 : vector<8x32xf32>
    %c0_52 = arith.constant 0 : index
    %c0_53 = arith.constant 0 : index
    %107 = vector.load %arg7[%c0_52, %c0_53] : memref<8x32xf32, #tpu.memory_space<vmem>>, vector<8x32xf32>
    tpu.vector_store %arg7[%c0_52, %c0_53], %106 {strides = array<i32>} : memref<8x32xf32, #tpu.memory_space<vmem>>, vector<8x32xf32>,
    %c0_54 = arith.constant 0 : index
    %c0_55 = arith.constant 0 : index
    %108 = vector.load %arg7[%c0_54, %c0_55] : memref<8x32xf32, #tpu.memory_space<vmem>>, vector<8x32xf32>
    %c0_56 = arith.constant 0 : index
    %c0_57 = arith.constant 0 : index
    %109 = vector.load %arg5[%c0_56, %c0_57] : memref<1x32xf32, #tpu.memory_space<vmem>>, vector<1x32xf32>
    %110 = vector.broadcast %109 : vector<1x32xf32> to vector<8x32xf32>
    %111 = arith.addf %108, %110 : vector<8x32xf32>
    %112 = vector.shape_cast %111 : vector<8x32xf32> to vector<1x8x32xf32>
    %c0_58 = arith.constant 0 : index
    %c0_59 = arith.constant 0 : index
    %c0_60 = arith.constant 0 : index
    %113 = vector.load %arg6[%c0_58, %c0_59, %c0_60] : memref<1x8x32xf32, #tpu.memory_space<vmem>>, vector<1x8x32xf32>
    tpu.vector_store %arg6[%c0_58, %c0_59, %c0_60], %112 {strides = array<i32>} : memref<1x8x32xf32, #tpu.memory_space<vmem>>, vector<1x8x32xf32>,
    return
  }
  func.func @transform_0(%arg0: i32) -> (i32, i32, i32) {
    %c0_i32 = arith.constant 0 : i32
    %c0_i32_0 = arith.constant 0 : i32
    %c0_i32_1 = arith.constant 0 : i32
    return %arg0, %c0_i32, %c0_i32_0 : i32, i32, i32
  }
  func.func @transform_1(%arg0: i32) -> (i32, i32) {
    %c0_i32 = arith.constant 0 : i32
    %c0_i32_0 = arith.constant 0 : i32
    %c0_i32_1 = arith.constant 0 : i32
    return %c0_i32, %c0_i32_0 : i32, i32
  }
  func.func @transform_2(%arg0: i32) -> (i32, i32) {
    %c0_i32 = arith.constant 0 : i32
    %c0_i32_0 = arith.constant 0 : i32
    %c0_i32_1 = arith.constant 0 : i32
    return %c0_i32, %c0_i32_0 : i32, i32
  }
  func.func @transform_3(%arg0: i32) -> (i32, i32, i32) {
    %c0_i32 = arith.constant 0 : i32
    %c0_i32_0 = arith.constant 0 : i32
    %c0_i32_1 = arith.constant 0 : i32
    %c0_i32_2 = arith.constant 0 : i32
    return %c0_i32, %c0_i32_0, %c0_i32_1 : i32, i32, i32
  }
  func.func @transform_4(%arg0: i32) -> (i32, i32) {
    %c0_i32 = arith.constant 0 : i32
    %c0_i32_0 = arith.constant 0 : i32
    %c0_i32_1 = arith.constant 0 : i32
    return %c0_i32, %c0_i32_0 : i32, i32
  }
  func.func @transform_5(%arg0: i32) -> (i32, i32, i32) {
    %c0_i32 = arith.constant 0 : i32
    %c0_i32_0 = arith.constant 0 : i32
    %c0_i32_1 = arith.constant 0 : i32
    return %arg0, %c0_i32, %c0_i32_0 : i32, i32, i32
  }
}

module attributes {stable_mosaic.version = 11 : i64} {
  func.func @_mha_kernel(%arg0: i32, %arg1: memref<1x8x32xf32, #tpu.memory_space<vmem>>, %arg2: memref<32x96xbf16, #tpu.memory_space<vmem>>, %arg3: memref<1x96xf32, #tpu.memory_space<vmem>>, %arg4: memref<4x8x32xbf16, #tpu.memory_space<vmem>>, %arg5: memref<1x32xf32, #tpu.memory_space<vmem>>, %arg6: memref<1x8x32xf32, #tpu.memory_space<vmem>>, %arg7: memref<8x32xf32, #tpu.memory_space<vmem>>) attributes {dimension_semantics = [#tpu.dimension_semantics<parallel>], iteration_bounds = array<i64: 2>, scalar_prefetch = 0 : i64, scratch_operands = 1 : i64, tpu.core_type = #tpu.core_type<tc>, window_params = [{transform_indices = @transform_0, window_bounds = array<i64: 1, 8, 32>}, {pipeline_mode = #tpu.pipeline_mode<synchronous>, transform_indices = @transform_1, window_bounds = array<i64: 32, 96>}, {pipeline_mode = #tpu.pipeline_mode<synchronous>, transform_indices = @transform_2, window_bounds = array<i64: 1, 96>}, {pipeline_mode = #tpu.pipeline_mode<synchronous>, transform_indices = @transform_3, window_bounds = array<i64: 4, 8, 32>}, {pipeline_mode = #tpu.pipeline_mode<synchronous>, transform_indices = @transform_4, window_bounds = array<i64: 1, 32>}, {transform_indices = @transform_5, window_bounds = array<i64: 1, 8, 32>}]} {
    %c0 = arith.constant 0 : index
    %c0_0 = arith.constant 0 : index
    %c0_1 = arith.constant 0 : index
    %0 = vector.load %arg1[%c0, %c0_0, %c0_1] : memref<1x8x32xf32, #tpu.memory_space<vmem>>, vector<1x8x32xf32>
    %1 = vector.shape_cast %0 : vector<1x8x32xf32> to vector<8x32xf32>
    %2 = arith.truncf %1 : vector<8x32xf32> to vector<8x32xbf16>
    %c0_2 = arith.constant 0 : index
    %c0_3 = arith.constant 0 : index
    %3 = vector.load %arg2[%c0_2, %c0_3] : memref<32x96xbf16, #tpu.memory_space<vmem>>, vector<32x96xbf16>
    %cst = arith.constant dense<0.000000e+00> : vector<8x96xf32>
    %4 = tpu.matmul %2, %3, %cst {dimension_numbers = #tpu.dot_dimension_numbers<[1], [0], [0], [1], [0, 0, 1, 1], [], []>} : vector<8x32xbf16>, vector<32x96xbf16>, vector<8x96xf32> -> vector<8x96xf32>
    %c0_4 = arith.constant 0 : index
    %c0_5 = arith.constant 0 : index
    %5 = vector.load %arg3[%c0_4, %c0_5] : memref<1x96xf32, #tpu.memory_space<vmem>>, vector<1x96xf32>
    %6 = vector.broadcast %5 : vector<1x96xf32> to vector<8x96xf32>
    %7 = arith.addf %4, %6 : vector<8x96xf32>
    %8 = arith.truncf %7 : vector<8x96xf32> to vector<8x96xbf16>
    %9 = vector.shape_cast %8 : vector<8x96xbf16> to vector<1x8x96xbf16>
    %cst_6 = arith.constant 0.000000e+00 : f32
    %10 = vector.broadcast %cst_6 : f32 to vector<8x32xf32>
    %c0_7 = arith.constant 0 : index
    %c0_8 = arith.constant 0 : index
    %11 = vector.load %arg7[%c0_7, %c0_8] : memref<8x32xf32, #tpu.memory_space<vmem>>, vector<8x32xf32>
    tpu.vector_store %arg7[%c0_7, %c0_8], %10 {strides = array<i32>} : memref<8x32xf32, #tpu.memory_space<vmem>>, vector<8x32xf32>,
    %12 = vector.extract_strided_slice %9 {offsets = [0, 0, 0], sizes = [1, 8, 8], strides = [1, 1, 1]} : vector<1x8x96xbf16> to vector<1x8x8xbf16>
    %13 = vector.extract_strided_slice %9 {offsets = [0, 0, 32], sizes = [1, 8, 8], strides = [1, 1, 1]} : vector<1x8x96xbf16> to vector<1x8x8xbf16>
    %14 = vector.extract_strided_slice %9 {offsets = [0, 0, 64], sizes = [1, 8, 8], strides = [1, 1, 1]} : vector<1x8x96xbf16> to vector<1x8x8xbf16>
    "tpu.trace_start"() <{level = 10 : i32, message = "bqd,bkd->bqk"}> : () -> ()
    %cst_9 = arith.constant dense<0.000000e+00> : vector<1x8x8xf32>
    %15 = tpu.matmul %12, %13, %cst_9 {dimension_numbers = #tpu.dot_dimension_numbers<[2], [2], [1], [1], [0, 0, 0, 1, 1, 1], [0], [0]>} : vector<1x8x8xbf16>, vector<1x8x8xbf16>, vector<1x8x8xf32> -> vector<1x8x8xf32>
    "tpu.trace_stop"() : () -> ()
    %cst_10 = arith.constant dense<0xFF800000> : vector<1x8xf32>
    %16 = vector.multi_reduction <maximumf>, %15, %cst_10 [2] : vector<1x8x8xf32> to vector<1x8xf32>
    %17 = vector.shape_cast %16 : vector<1x8xf32> to vector<1x8x1xf32>
    %18 = vector.broadcast %17 : vector<1x8x1xf32> to vector<1x8x8xf32>
    %19 = arith.subf %15, %18 : vector<1x8x8xf32>
    %20 = math.exp %19 : vector<1x8x8xf32>
    %cst_11 = arith.constant dense<0.000000e+00> : vector<1x8xf32>
    %21 = vector.multi_reduction <add>, %20, %cst_11 [2] : vector<1x8x8xf32> to vector<1x8xf32>
    %22 = vector.shape_cast %21 : vector<1x8xf32> to vector<1x8x1xf32>
    %23 = arith.truncf %20 : vector<1x8x8xf32> to vector<1x8x8xbf16>
    "tpu.trace_start"() <{level = 10 : i32, message = "bqk,bkd->bqd"}> : () -> ()
    %cst_12 = arith.constant dense<0.000000e+00> : vector<1x8x8xf32>
    %24 = tpu.matmul %23, %14, %cst_12 {dimension_numbers = #tpu.dot_dimension_numbers<[2], [1], [1], [2], [0, 0, 0, 1, 1, 2], [0], [0]>} : vector<1x8x8xbf16>, vector<1x8x8xbf16>, vector<1x8x8xf32> -> vector<1x8x8xf32>
    "tpu.trace_stop"() : () -> ()
    %25 = tpu.reciprocal %22 {approx = true} : vector<1x8x1xf32> -> vector<1x8x1xf32>
    %26 = vector.broadcast %25 : vector<1x8x1xf32> to vector<1x8x8xf32>
    %27 = arith.mulf %24, %26 : vector<1x8x8xf32>
    %c0_13 = arith.constant 0 : index
    %c0_14 = arith.constant 0 : index
    %28 = vector.load %arg7[%c0_13, %c0_14] : memref<8x32xf32, #tpu.memory_space<vmem>>, vector<8x32xf32>
    %29 = vector.shape_cast %27 : vector<1x8x8xf32> to vector<8x8xf32>
    %30 = arith.truncf %29 : vector<8x8xf32> to vector<8x8xbf16>
    %c0_15 = arith.constant 0 : index
    %c0_16 = arith.constant 0 : index
    %c0_17 = arith.constant 0 : index
    %31 = vector.load %arg4[%c0_15, %c0_16, %c0_17] : memref<4x8x32xbf16, #tpu.memory_space<vmem>>, vector<1x8x32xbf16>
    %32 = vector.shape_cast %31 : vector<1x8x32xbf16> to vector<8x32xbf16>
    %cst_18 = arith.constant dense<0.000000e+00> : vector<8x32xf32>
    %33 = tpu.matmul %30, %32, %cst_18 {dimension_numbers = #tpu.dot_dimension_numbers<[1], [0], [0], [1], [0, 0, 1, 1], [], []>} : vector<8x8xbf16>, vector<8x32xbf16>, vector<8x32xf32> -> vector<8x32xf32>
    %34 = arith.addf %28, %33 : vector<8x32xf32>
    %c0_19 = arith.constant 0 : index
    %c0_20 = arith.constant 0 : index
    %35 = vector.load %arg7[%c0_19, %c0_20] : memref<8x32xf32, #tpu.memory_space<vmem>>, vector<8x32xf32>
    tpu.vector_store %arg7[%c0_19, %c0_20], %34 {strides = array<i32>} : memref<8x32xf32, #tpu.memory_space<vmem>>, vector<8x32xf32>,
    %36 = vector.extract_strided_slice %9 {offsets = [0, 0, 8], sizes = [1, 8, 8], strides = [1, 1, 1]} : vector<1x8x96xbf16> to vector<1x8x8xbf16>
    %37 = vector.extract_strided_slice %9 {offsets = [0, 0, 40], sizes = [1, 8, 8], strides = [1, 1, 1]} : vector<1x8x96xbf16> to vector<1x8x8xbf16>
    %38 = vector.extract_strided_slice %9 {offsets = [0, 0, 72], sizes = [1, 8, 8], strides = [1, 1, 1]} : vector<1x8x96xbf16> to vector<1x8x8xbf16>
    "tpu.trace_start"() <{level = 10 : i32, message = "bqd,bkd->bqk"}> : () -> ()
    %cst_21 = arith.constant dense<0.000000e+00> : vector<1x8x8xf32>
    %39 = tpu.matmul %36, %37, %cst_21 {dimension_numbers = #tpu.dot_dimension_numbers<[2], [2], [1], [1], [0, 0, 0, 1, 1, 1], [0], [0]>} : vector<1x8x8xbf16>, vector<1x8x8xbf16>, vector<1x8x8xf32> -> vector<1x8x8xf32>
    "tpu.trace_stop"() : () -> ()
    %cst_22 = arith.constant dense<0xFF800000> : vector<1x8xf32>
    %40 = vector.multi_reduction <maximumf>, %39, %cst_22 [2] : vector<1x8x8xf32> to vector<1x8xf32>
    %41 = vector.shape_cast %40 : vector<1x8xf32> to vector<1x8x1xf32>
    %42 = vector.broadcast %41 : vector<1x8x1xf32> to vector<1x8x8xf32>
    %43 = arith.subf %39, %42 : vector<1x8x8xf32>
    %44 = math.exp %43 : vector<1x8x8xf32>
    %cst_23 = arith.constant dense<0.000000e+00> : vector<1x8xf32>
    %45 = vector.multi_reduction <add>, %44, %cst_23 [2] : vector<1x8x8xf32> to vector<1x8xf32>
    %46 = vector.shape_cast %45 : vector<1x8xf32> to vector<1x8x1xf32>
    %47 = arith.truncf %44 : vector<1x8x8xf32> to vector<1x8x8xbf16>
    "tpu.trace_start"() <{level = 10 : i32, message = "bqk,bkd->bqd"}> : () -> ()
    %cst_24 = arith.constant dense<0.000000e+00> : vector<1x8x8xf32>
    %48 = tpu.matmul %47, %38, %cst_24 {dimension_numbers = #tpu.dot_dimension_numbers<[2], [1], [1], [2], [0, 0, 0, 1, 1, 2], [0], [0]>} : vector<1x8x8xbf16>, vector<1x8x8xbf16>, vector<1x8x8xf32> -> vector<1x8x8xf32>
    "tpu.trace_stop"() : () -> ()
    %49 = tpu.reciprocal %46 {approx = true} : vector<1x8x1xf32> -> vector<1x8x1xf32>
    %50 = vector.broadcast %49 : vector<1x8x1xf32> to vector<1x8x8xf32>
    %51 = arith.mulf %48, %50 : vector<1x8x8xf32>
    %c0_25 = arith.constant 0 : index
    %c0_26 = arith.constant 0 : index
    %52 = vector.load %arg7[%c0_25, %c0_26] : memref<8x32xf32, #tpu.memory_space<vmem>>, vector<8x32xf32>
    %53 = vector.shape_cast %51 : vector<1x8x8xf32> to vector<8x8xf32>
    %54 = arith.truncf %53 : vector<8x8xf32> to vector<8x8xbf16>
    %c1 = arith.constant 1 : index
    %c0_27 = arith.constant 0 : index
    %c0_28 = arith.constant 0 : index
    %55 = vector.load %arg4[%c1, %c0_27, %c0_28] : memref<4x8x32xbf16, #tpu.memory_space<vmem>>, vector<1x8x32xbf16>
    %56 = vector.shape_cast %55 : vector<1x8x32xbf16> to vector<8x32xbf16>
    %cst_29 = arith.constant dense<0.000000e+00> : vector<8x32xf32>
    %57 = tpu.matmul %54, %56, %cst_29 {dimension_numbers = #tpu.dot_dimension_numbers<[1], [0], [0], [1], [0, 0, 1, 1], [], []>} : vector<8x8xbf16>, vector<8x32xbf16>, vector<8x32xf32> -> vector<8x32xf32>
    %58 = arith.addf %52, %57 : vector<8x32xf32>
    %c0_30 = arith.constant 0 : index
    %c0_31 = arith.constant 0 : index
    %59 = vector.load %arg7[%c0_30, %c0_31] : memref<8x32xf32, #tpu.memory_space<vmem>>, vector<8x32xf32>
    tpu.vector_store %arg7[%c0_30, %c0_31], %58 {strides = array<i32>} : memref<8x32xf32, #tpu.memory_space<vmem>>, vector<8x32xf32>,
    %60 = vector.extract_strided_slice %9 {offsets = [0, 0, 16], sizes = [1, 8, 8], strides = [1, 1, 1]} : vector<1x8x96xbf16> to vector<1x8x8xbf16>
    %61 = vector.extract_strided_slice %9 {offsets = [0, 0, 48], sizes = [1, 8, 8], strides = [1, 1, 1]} : vector<1x8x96xbf16> to vector<1x8x8xbf16>
    %62 = vector.extract_strided_slice %9 {offsets = [0, 0, 80], sizes = [1, 8, 8], strides = [1, 1, 1]} : vector<1x8x96xbf16> to vector<1x8x8xbf16>
    "tpu.trace_start"() <{level = 10 : i32, message = "bqd,bkd->bqk"}> : () -> ()
    %cst_32 = arith.constant dense<0.000000e+00> : vector<1x8x8xf32>
    %63 = tpu.matmul %60, %61, %cst_32 {dimension_numbers = #tpu.dot_dimension_numbers<[2], [2], [1], [1], [0, 0, 0, 1, 1, 1], [0], [0]>} : vector<1x8x8xbf16>, vector<1x8x8xbf16>, vector<1x8x8xf32> -> vector<1x8x8xf32>
    "tpu.trace_stop"() : () -> ()
    %cst_33 = arith.constant dense<0xFF800000> : vector<1x8xf32>
    %64 = vector.multi_reduction <maximumf>, %63, %cst_33 [2] : vector<1x8x8xf32> to vector<1x8xf32>
    %65 = vector.shape_cast %64 : vector<1x8xf32> to vector<1x8x1xf32>
    %66 = vector.broadcast %65 : vector<1x8x1xf32> to vector<1x8x8xf32>
    %67 = arith.subf %63, %66 : vector<1x8x8xf32>
    %68 = math.exp %67 : vector<1x8x8xf32>
    %cst_34 = arith.constant dense<0.000000e+00> : vector<1x8xf32>
    %69 = vector.multi_reduction <add>, %68, %cst_34 [2] : vector<1x8x8xf32> to vector<1x8xf32>
    %70 = vector.shape_cast %69 : vector<1x8xf32> to vector<1x8x1xf32>
    %71 = arith.truncf %68 : vector<1x8x8xf32> to vector<1x8x8xbf16>
    "tpu.trace_start"() <{level = 10 : i32, message = "bqk,bkd->bqd"}> : () -> ()
    %cst_35 = arith.constant dense<0.000000e+00> : vector<1x8x8xf32>
    %72 = tpu.matmul %71, %62, %cst_35 {dimension_numbers = #tpu.dot_dimension_numbers<[2], [1], [1], [2], [0, 0, 0, 1, 1, 2], [0], [0]>} : vector<1x8x8xbf16>, vector<1x8x8xbf16>, vector<1x8x8xf32> -> vector<1x8x8xf32>
    "tpu.trace_stop"() : () -> ()
    %73 = tpu.reciprocal %70 {approx = true} : vector<1x8x1xf32> -> vector<1x8x1xf32>
    %74 = vector.broadcast %73 : vector<1x8x1xf32> to vector<1x8x8xf32>
    %75 = arith.mulf %72, %74 : vector<1x8x8xf32>
    %c0_36 = arith.constant 0 : index
    %c0_37 = arith.constant 0 : index
    %76 = vector.load %arg7[%c0_36, %c0_37] : memref<8x32xf32, #tpu.memory_space<vmem>>, vector<8x32xf32>
    %77 = vector.shape_cast %75 : vector<1x8x8xf32> to vector<8x8xf32>
    %78 = arith.truncf %77 : vector<8x8xf32> to vector<8x8xbf16>
    %c2 = arith.constant 2 : index
    %c0_38 = arith.constant 0 : index
    %c0_39 = arith.constant 0 : index
    %79 = vector.load %arg4[%c2, %c0_38, %c0_39] : memref<4x8x32xbf16, #tpu.memory_space<vmem>>, vector<1x8x32xbf16>
    %80 = vector.shape_cast %79 : vector<1x8x32xbf16> to vector<8x32xbf16>
    %cst_40 = arith.constant dense<0.000000e+00> : vector<8x32xf32>
    %81 = tpu.matmul %78, %80, %cst_40 {dimension_numbers = #tpu.dot_dimension_numbers<[1], [0], [0], [1], [0, 0, 1, 1], [], []>} : vector<8x8xbf16>, vector<8x32xbf16>, vector<8x32xf32> -> vector<8x32xf32>
    %82 = arith.addf %76, %81 : vector<8x32xf32>
    %c0_41 = arith.constant 0 : index
    %c0_42 = arith.constant 0 : index
    %83 = vector.load %arg7[%c0_41, %c0_42] : memref<8x32xf32, #tpu.memory_space<vmem>>, vector<8x32xf32>
    tpu.vector_store %arg7[%c0_41, %c0_42], %82 {strides = array<i32>} : memref<8x32xf32, #tpu.memory_space<vmem>>, vector<8x32xf32>,
    %84 = vector.extract_strided_slice %9 {offsets = [0, 0, 24], sizes = [1, 8, 8], strides = [1, 1, 1]} : vector<1x8x96xbf16> to vector<1x8x8xbf16>
    %85 = vector.extract_strided_slice %9 {offsets = [0, 0, 56], sizes = [1, 8, 8], strides = [1, 1, 1]} : vector<1x8x96xbf16> to vector<1x8x8xbf16>
    %86 = vector.extract_strided_slice %9 {offsets = [0, 0, 88], sizes = [1, 8, 8], strides = [1, 1, 1]} : vector<1x8x96xbf16> to vector<1x8x8xbf16>
    "tpu.trace_start"() <{level = 10 : i32, message = "bqd,bkd->bqk"}> : () -> ()
    %cst_43 = arith.constant dense<0.000000e+00> : vector<1x8x8xf32>
    %87 = tpu.matmul %84, %85, %cst_43 {dimension_numbers = #tpu.dot_dimension_numbers<[2], [2], [1], [1], [0, 0, 0, 1, 1, 1], [0], [0]>} : vector<1x8x8xbf16>, vector<1x8x8xbf16>, vector<1x8x8xf32> -> vector<1x8x8xf32>
    "tpu.trace_stop"() : () -> ()
    %cst_44 = arith.constant dense<0xFF800000> : vector<1x8xf32>
    %88 = vector.multi_reduction <maximumf>, %87, %cst_44 [2] : vector<1x8x8xf32> to vector<1x8xf32>
    %89 = vector.shape_cast %88 : vector<1x8xf32> to vector<1x8x1xf32>
    %90 = vector.broadcast %89 : vector<1x8x1xf32> to vector<1x8x8xf32>
    %91 = arith.subf %87, %90 : vector<1x8x8xf32>
    %92 = math.exp %91 : vector<1x8x8xf32>
    %cst_45 = arith.constant dense<0.000000e+00> : vector<1x8xf32>
    %93 = vector.multi_reduction <add>, %92, %cst_45 [2] : vector<1x8x8xf32> to vector<1x8xf32>
    %94 = vector.shape_cast %93 : vector<1x8xf32> to vector<1x8x1xf32>
    %95 = arith.truncf %92 : vector<1x8x8xf32> to vector<1x8x8xbf16>
    "tpu.trace_start"() <{level = 10 : i32, message = "bqk,bkd->bqd"}> : () -> ()
    %cst_46 = arith.constant dense<0.000000e+00> : vector<1x8x8xf32>
    %96 = tpu.matmul %95, %86, %cst_46 {dimension_numbers = #tpu.dot_dimension_numbers<[2], [1], [1], [2], [0, 0, 0, 1, 1, 2], [0], [0]>} : vector<1x8x8xbf16>, vector<1x8x8xbf16>, vector<1x8x8xf32> -> vector<1x8x8xf32>
    "tpu.trace_stop"() : () -> ()
    %97 = tpu.reciprocal %94 {approx = true} : vector<1x8x1xf32> -> vector<1x8x1xf32>
    %98 = vector.broadcast %97 : vector<1x8x1xf32> to vector<1x8x8xf32>
    %99 = arith.mulf %96, %98 : vector<1x8x8xf32>
    %c0_47 = arith.constant 0 : index
    %c0_48 = arith.constant 0 : index
    %100 = vector.load %arg7[%c0_47, %c0_48] : memref<8x32xf32, #tpu.memory_space<vmem>>, vector<8x32xf32>
    %101 = vector.shape_cast %99 : vector<1x8x8xf32> to vector<8x8xf32>
    %102 = arith.truncf %101 : vector<8x8xf32> to vector<8x8xbf16>
    %c3 = arith.constant 3 : index
    %c0_49 = arith.constant 0 : index
    %c0_50 = arith.constant 0 : index
    %103 = vector.load %arg4[%c3, %c0_49, %c0_50] : memref<4x8x32xbf16, #tpu.memory_space<vmem>>, vector<1x8x32xbf16>
    %104 = vector.shape_cast %103 : vector<1x8x32xbf16> to vector<8x32xbf16>
    %cst_51 = arith.constant dense<0.000000e+00> : vector<8x32xf32>
    %105 = tpu.matmul %102, %104, %cst_51 {dimension_numbers = #tpu.dot_dimension_numbers<[1], [0], [0], [1], [0, 0, 1, 1], [], []>} : vector<8x8xbf16>, vector<8x32xbf16>, vector<8x32xf32> -> vector<8x32xf32>
    %106 = arith.addf %100, %105 : vector<8x32xf32>
    %c0_52 = arith.constant 0 : index
    %c0_53 = arith.constant 0 : index
    %107 = vector.load %arg7[%c0_52, %c0_53] : memref<8x32xf32, #tpu.memory_space<vmem>>, vector<8x32xf32>
    tpu.vector_store %arg7[%c0_52, %c0_53], %106 {strides = array<i32>} : memref<8x32xf32, #tpu.memory_space<vmem>>, vector<8x32xf32>,
    %c0_54 = arith.constant 0 : index
    %c0_55 = arith.constant 0 : index
    %108 = vector.load %arg7[%c0_54, %c0_55] : memref<8x32xf32, #tpu.memory_space<vmem>>, vector<8x32xf32>
    %c0_56 = arith.constant 0 : index
    %c0_57 = arith.constant 0 : index
    %109 = vector.load %arg5[%c0_56, %c0_57] : memref<1x32xf32, #tpu.memory_space<vmem>>, vector<1x32xf32>
    %110 = vector.broadcast %109 : vector<1x32xf32> to vector<8x32xf32>
    %111 = arith.addf %108, %110 : vector<8x32xf32>
    %112 = vector.shape_cast %111 : vector<8x32xf32> to vector<1x8x32xf32>
    %c0_58 = arith.constant 0 : index
    %c0_59 = arith.constant 0 : index
    %c0_60 = arith.constant 0 : index
    %113 = vector.load %arg6[%c0_58, %c0_59, %c0_60] : memref<1x8x32xf32, #tpu.memory_space<vmem>>, vector<1x8x32xf32>
    tpu.vector_store %arg6[%c0_58, %c0_59, %c0_60], %112 {strides = array<i32>} : memref<1x8x32xf32, #tpu.memory_space<vmem>>, vector<1x8x32xf32>,
    return
  }
  func.func @transform_0(%arg0: i32) -> (i32, i32, i32) {
    %c0_i32 = arith.constant 0 : i32
    %c0_i32_0 = arith.constant 0 : i32
    %c0_i32_1 = arith.constant 0 : i32
    return %arg0, %c0_i32, %c0_i32_0 : i32, i32, i32
  }
  func.func @transform_1(%arg0: i32) -> (i32, i32) {
    %c0_i32 = arith.constant 0 : i32
    %c0_i32_0 = arith.constant 0 : i32
    %c0_i32_1 = arith.constant 0 : i32
    return %c0_i32, %c0_i32_0 : i32, i32
  }
  func.func @transform_2(%arg0: i32) -> (i32, i32) {
    %c0_i32 = arith.constant 0 : i32
    %c0_i32_0 = arith.constant 0 : i32
    %c0_i32_1 = arith.constant 0 : i32
    return %c0_i32, %c0_i32_0 : i32, i32
  }
  func.func @transform_3(%arg0: i32) -> (i32, i32, i32) {
    %c0_i32 = arith.constant 0 : i32
    %c0_i32_0 = arith.constant 0 : i32
    %c0_i32_1 = arith.constant 0 : i32
    %c0_i32_2 = arith.constant 0 : i32
    return %c0_i32, %c0_i32_0, %c0_i32_1 : i32, i32, i32
  }
  func.func @transform_4(%arg0: i32) -> (i32, i32) {
    %c0_i32 = arith.constant 0 : i32
    %c0_i32_0 = arith.constant 0 : i32
    %c0_i32_1 = arith.constant 0 : i32
    return %c0_i32, %c0_i32_0 : i32, i32
  }
  func.func @transform_5(%arg0: i32) -> (i32, i32, i32) {
    %c0_i32 = arith.constant 0 : i32
    %c0_i32_0 = arith.constant 0 : i32
    %c0_i32_1 = arith.constant 0 : i32
    return %arg0, %c0_i32, %c0_i32_0 : i32, i32, i32
  }
}

</mosaic_0001>

<bundles_post_ra>
// kernel: tpu_custom_call.1
= control target key start
LH: loop header
LB: loop body
LE: loop exit
PB: predicated region body
PF: predicated region fallthrough
CT: control target
= control target key end

     0   :  { %10 = vsyncpa [#allocation4], 0  ;;  %s1882_s0 = inlined_call_operand.hbm [shape: f32[2,8,32], index: 0, kind: input, shape index: {}]   ;;  %s1883_s1 = inlined_call_operand.hbm [shape: bf16[32,96], index: 1, kind: input, shape index: {}]   ;;  %s1884_s2 = inlined_call_operand.vmem [shape: f32[1,96], index: 2, kind: input, shape index: {}]   ;;  %s1885_s3 = inlined_call_operand.hbm [shape: bf16[4,8,32], index: 3, kind: input, shape index: {}]   ;;  %s1886_s4 = inlined_call_operand.vmem [shape: f32[1,32], index: 4, kind: input, shape index: {}]   ;;  %s1887_s5 = inlined_call_operand.hbm [shape: f32[2,8,32], index: 5, kind: output, shape index: {}]  }
   0x1   :  { %12 = vsyncpa [#allocation4 + $0x1], 0 }
   0x2   :  { %13 = vsyncpa [#allocation7], 0 }
   0x3   :  { %14 = vsyncpa [#allocation5], 0 }
   0x4   :  { %16 = vsyncpa [#allocation5 + $0x1], 0  ;;  %s1549_s18 = smov 0   ;;  %s1551_s19 = smov 0  }
   0x5   :  { %s1553_s20 = smov 0   ;;  %s1555_s21 = smov 0  }
   0x6 LB: > { %s1570_s22 = sadd.s32 4294967295, %s1498_s21   ;;  %s1102_s23 = sadd.s32 4294967294, %s1498_s21   ;;  %s1498_s21 = sphi %s1555_s21, %s1907_s21   ;;  %s1494_s20 = sphi %s1553_s20, %s1906_s20   ;;  %s1490_s19 = sphi %s1551_s19, %s1905_s19   ;;  %s1486_s18 = sphi %s1549_s18, %s1904_s18  }
   0x7   : > { %p42_p0 = scmp.ne.s32.totalorder %s1490_s19, %s1486_s18  ;;  %p1888_p1 = scmp.eq.s32.totalorder %s1570_s22, 0 }
   0x8   : > { %p156_p3 = scmp.eq.s32.totalorder %s1102_s23, 1  ;;  %p1103_p5 = scmp.ge.s32.totalorder %s1498_s21, 1 }
   0x9   : > { %p1579_p4 = por %p1888_p1, %p42_p0  ;;  %p163_p7 = scmp.lt.s32.totalorder %s1498_s21, 3 }
   0xa   : > { %p1584_p6 = por %p156_p3, %p42_p0  ;;  %s1500_s27 = smov [#allocation6]  }
   0xb   : > { %s1891_s24 = scalar_select %p1579_p4, 1, 0 }
   0xc   : > { %s1892_s25 = scalar_select %p1584_p6, 1, 0 }
   0xd   : > { %p1589_p8 = pnand %p1103_p5, %p163_p7  ;;  %s175_s28 = sshll.u32 %s1500_s27, 4  ;;  %s1593_s28 = int_to_ptr.vmem [resolvable:$true] %s175_s28 }
   0xe   : > { %s1501_s30 = smov [#allocation8]   ;;  %s1342_s9 = scalar_lea.hbm %s1883_s1, 256 }
   0xf   : > { %p1254_p9 = pneg %p1589_p8  ;;  %s191_s6 = sshll.u32 %s1501_s30, 4  ;;  %s1604_s6 = int_to_ptr.vmem [resolvable:$true] %s191_s6 }
  0x10   : > { %p1343_p12 = scmp.ne.s32.totalorder %s1883_s1, %s1342_s9  ;;  %p1349_p5 = scmp.lt.u32.totalorder %s1342_s9, %s1883_s1 }
  0x11   : > { %p1600_p11 = pnand %p1254_p9, %p1888_p1 }
  0x13   : > { %p1344_p13 = pneg %p1600_p11 }
  0x15   : > { %p1345_p0 = pnand %p1344_p13, %p1343_p12 }
  0x17   : > { %p1346_p3 = pneg %p1345_p0 }
  0x19   : > { %p1351_p7 = pnand %p1349_p5, %p1346_p3 }
  0x1b   : > { %1354 = shalt.err (!%p1351_p7)
}
  0x1c   : > { %s1355_s14 = scalar_lea.vmem %s1593_s28, 256  ;;  %p1363_p2 = scmp.lt.s32.totalorder %s1593_s28, %s1593_s28 }
  0x1d   : > { %p1356_p9 = scmp.ne.s32.totalorder %s1593_s28, %s1355_s14  ;;  %p1364_p12 = scmp.lt.s32.totalorder %s1355_s14, %s1355_s14 }
  0x1f   : > { %p1358_p10 = pnand %p1356_p9, %p1344_p13  ;;  %p1365_p0 = por %p1364_p12, %p1363_p2 }
  0x21   : > { %p1359_p1 = pneg %p1358_p10 }
  0x23   : > { %p1366_p6 = pnand %p1365_p0, %p1359_p1 }
  0x25   : > { %1369 = shalt.err (!%p1366_p6)
}
  0x26   : > { %s1502_s15 = smov 64   ;;  %s1503_s16 = smov 4  }
  0x27   : > { %1257 = dma.hbm_to_vmem [thread:$0]  (!%p1600_p11), %s1883_s1, 256, %s1593_s28, [#allocation7], %s1502_s15, %s1502_s15, %s1503_s16  }
  0x28   : > { %s1370_s7 = scalar_lea.hbm %s1885_s3, 256 }
  0x29   : > { %p1371_p2 = scmp.ne.s32.totalorder %s1885_s3, %s1370_s7  ;;  %p1377_p10 = scmp.lt.u32.totalorder %s1370_s7, %s1885_s3 }
  0x2b   : > { %p1373_p1 = pnand %p1371_p2, %p1344_p13 }
  0x2d   : > { %p1374_p6 = pneg %p1373_p1 }
  0x2f   : > { %p1379_p3 = pnand %p1377_p10, %p1374_p6 }
  0x31   : > { %1382 = shalt.err (!%p1379_p3)
}
  0x32   : > { %s1383_s28 = scalar_lea.vmem %s1604_s6, 256  ;;  %p1391_p12 = scmp.lt.s32.totalorder %s1604_s6, %s1604_s6 }
  0x33   : > { %p1384_p5 = scmp.ne.s32.totalorder %s1604_s6, %s1383_s28  ;;  %p1392_p0 = scmp.lt.s32.totalorder %s1383_s28, %s1383_s28 }
  0x35   : > { %p1386_p7 = pnand %p1384_p5, %p1344_p13  ;;  %p1393_p2 = por %p1392_p0, %p1391_p12 }
  0x37   : > { %p1387_p9 = pneg %p1386_p7 }
  0x39   : > { %p1394_p1 = pnand %p1393_p2, %p1387_p9 }
  0x3b   : > { %1397 = shalt.err (!%p1394_p1)
}
  0x3c   : > { %1260 = dma.hbm_to_vmem [thread:$0]  (!%p1600_p11), %s1885_s3, 256, %s1604_s6, [#allocation7], %s1502_s15, %s1502_s15, %s1503_s16  }
  0x3d   : > { %s1659_s14 = sadd.s32 1, %s1498_s21   ;;  %s29_s29 = sadd.s32 1, %s1494_s20 }
  0x3e   : > { %s26_s17 = ssub.s32 %s1498_s21, %s1659_s14  ;;  %p36_p13 = scmp.ne.s32.totalorder %s1494_s20, %s1490_s19 }
  0x3f   : > { %p27_p6 = scmp.eq.s32.totalorder %s26_s17, 0  ;;  %p37_p10 = scmp.eq.s32.totalorder %s1498_s21, 0 }
  0x40   : > { %p1895_p3 = scmp.eq.s32.totalorder %s1570_s22, 1  ;;  %p1271_p7 = scmp.lt.s32.totalorder %s1498_s21, 2 }
  0x41   : > { %s1675_s27 = scalar_select %p27_p6, %s1494_s20, %s29_s29  }
  0x42   : > { %p1669_p5 = por %p1895_p3, %p36_p13  ;;  %p38_p9 = por %p37_p10, %p36_p13 }
  0x43   : > { %s208_s30 = sand.u32 1, %s1494_s20   ;;  %s1108_s6 = sshll.u32 %s1498_s21, 7 }
  0x44   : > { %s1896_s23 = scalar_select %p1669_p5, 1, 0 }
  0x45   : > { %s1107_s7 = sshll.u32 %s208_s30, 3  ;;  %s1682_s8 = scalar_lea.hbm %s1882_s0, %s1108_s6 }
  0x46   : > { %s212_s9 = scalar_lea.vmem [#allocation3], %s1107_s7  ;;  %p1686_p11 = pnand %p1271_p7, %p38_p9 }
  0x47   : > { %s219_s10 = sshll.u32 %s212_s9, 4  ;;  %s209_s28 = scalar_lea.sflag [#allocation4], %s208_s30  ;;  %s1684_s10 = int_to_ptr.vmem [resolvable:$true] %s219_s10 }
  0x48   : > { %s1398_s12 = scalar_lea.hbm %s1682_s8, 128  ;;  %p1400_p0 = pneg %p1686_p11 }
  0x49   : > { %p1399_p12 = scmp.ne.s32.totalorder %s1682_s8, %s1398_s12  ;;  %s1403_s17 = scalar_lea.hbm %s1882_s0, 256 }
  0x4a   : > { %p1404_p13 = scmp.lt.u32.totalorder %s1682_s8, %s1882_s0  ;;  %p1405_p6 = scmp.lt.u32.totalorder %s1403_s17, %s1398_s12 }
  0x4b   : > { %p1401_p2 = pnand %p1400_p0, %p1399_p12  ;;  %p1407_p3 = scmp.lt.u32.totalorder %s1398_s12, %s1682_s8 }
  0x4c   : > { %p1406_p10 = por %p1405_p6, %p1404_p13 }
  0x4d   : > { %p1402_p1 = pneg %p1401_p2 }
  0x4e   : > { %p1408_p7 = por %p1407_p3, %p1406_p10 }
  0x50   : > { %p1409_p9 = pnand %p1408_p7, %p1402_p1 }
  0x52   : > { %1412 = shalt.err (!%p1409_p9)
}
  0x53   : > { %s1413_s30 = scalar_lea.vmem %s1684_s10, 128  ;;  %s1504_s15 = smov [#allocation3]  }
  0x54   : > { %p1414_p12 = scmp.ne.s32.totalorder %s1684_s10, %s1413_s30  ;;  %s1418_s16 = sshll.u32 %s1504_s15, 4  ;;  %s1419_s16 = int_to_ptr.vmem [resolvable:$false] %s1418_s16 }
  0x55   : > { %s1420_s9 = scalar_lea.vmem %s1419_s16, 256  ;;  %p1421_p4 = scmp.lt.s32.totalorder %s1684_s10, %s1419_s16 }
  0x56   : > { %p1416_p2 = pnand %p1414_p12, %p1400_p0  ;;  %p1422_p13 = scmp.lt.s32.totalorder %s1420_s9, %s1413_s30 }
  0x58   : > { %p1417_p5 = pneg %p1416_p2  ;;  %p1423_p6 = por %p1422_p13, %p1421_p4 }
  0x5a   : > { %p1424_p10 = pnand %p1423_p6, %p1417_p5 }
  0x5c   : > { %1427 = shalt.err (!%p1424_p10)
}
  0x5d   : > { %1264 = dma.hbm_to_vmem [thread:$0]  (!%p1686_p11), %s1682_s8, 128, %s1684_s10, %s209_s28  }
  0x5e   : > { %228 = sbr.rel (%p1589_p8) target bundleno = 2420 (0x974), region = 40  ;;  %s1718_s12 = sand.u32 (!%p1589_p8), 1, %s1490_s19  }
  0x5f   : > { %s1110_s13 = sshll.u32 (!%p1589_p8), %s1718_s12, 3  ;;  %s231_s29 = scalar_lea.sflag (!%p1589_p8), [#allocation4], %s1718_s12 }
  0x60   : > { %s234_s17 = scalar_lea.vmem (!%p1589_p8), [#allocation3], %s1110_s13  ;;  %p1898_p4 = scmp.ne.s32.totalorder (!%p1589_p8), %s1891_s24, 0 }
  0x65   : > { %1473 = dma.done.wait (%p1898_p4), %s231_s29, 128  }
  0x66   : > { %1475 = vsyncadd (%p1898_p4), %s231_s29, 4294967168  ;;  %p1899_p5 = scmp.eq.s32.totalorder %s1570_s22, 0 }
  0x68   : > { %1477 = dma.done.wait (%p1899_p5), [#allocation7], 512   ;;  %p1900_p8 = pmov %p1899_p5 }
  0x69   : > { %vm295_vm0 = vcmask 261120   ;;  %v1505_v0 = vmov 0.0   ;;  %vm1506_vm1 = vmmov 0   ;;  %v1324_v1 = vld [vmem:[#allocation6] sm:$0xff]   ;;  %v1325_v2 = vld [vmem:[#allocation6 + $0x8] sm:$0xff]   ;;  %v270_v3 = vld [vmem:[%s234_s17] sm:$0xff] }
  0x6a   : > { %1479 = vsyncadd (%p1900_p8), [#allocation7], 4294966784  ;;  %1162 = vmatprep.subr.bf16.mxu0 %v1505_v0  ;;  %1166 = vmatprep.mubr.msk.bf16.mxu0 %vm1506_vm1, %v1505_v0  ;;  %340 = vst.msk [vmem:[#allocation2] sm:$0xff] %vm295_vm0, %v1505_v0  ;;  %v271_v4 = vpack.c.bf16 %v270_v3, %v270_v3  ;;  %v1114_v5 = vld [vmem:[%s1884_s2] ss:$0 sm:$0xff]  ;;  %s1507_s8 = smov 64  }
  0x6b   : > { %1170 = vmatprep.subr.bf16.mxu1 %v1505_v0  ;;  %1172 = vmatprep.mubr.msk.bf16.mxu1 %vm1506_vm1, %v1505_v0  ;;  %s1508_s10 = smov 96   ;;  %s1509_s11 = smov 88   ;;  %vm406_vm2 = vcmask 1043456   ;;  %vm344_vm3 = vcmask 64512   ;;  %v454_v30 = vld [vmem:[#allocation8] sm:$0xf] }
  0x6c   : > { %1163 = vmatpush3.bf16.msra.mxu0 %v1324_v1  ;;  %s1510_s28 = smov 120   ;;  %s1511_s7 = smov 80   ;;  %v459_v31 = vsel %vm406_vm2, %v454_v30, 0  ;;  %v616_v62 = vld [vmem:[#allocation8 + $0x4] sm:$0xf] }
  0x6d   : > { %1164 = vmatprep.subr.bf16.mxu0 %v1505_v0  ;;  %s1512_s6 = smov 56   ;;  %s1513_s30 = smov 112   ;;  %v621_v63 = vsel %vm406_vm2, %v616_v62, 0 }
  0x6e   : > { %s1514_s15 = smov 48   ;;  %s1515_s16 = smov 104  }
  0x6f   : > { %s1516_s9 = smov 72   ;;  %s1517_s29 = smov 40  }
  0x70   : > { %1165 = vmatpush3.bf16.msra.mxu0 %v1325_v2  ;;  %s1132_s26 = sshll.u32 %s1570_s22, 7  ;;  %p1901_p0 = scmp.ne.s32.totalorder %s1896_s23, 0 }
  0x71   : > { %1176 = vmatprep.subr.bf16.mxu0 %v1505_v0  ;;  %v452_v56 = vld [vmem:[#allocation2] sm:$0xff]  ;;  %s1518_s22 = smov [#allocation9]  }
  0x73   : > { %1167 = vmatmul.mubr.msk.bf16.vlgmr.msra.gmra.mrb[0].mxu0 %vm295_vm0, %v271_v4 }
  0x74   : > { %1178 = vmatprep.mubr.msk.bf16.mxu0 %vm1506_vm1, %v1505_v0 }
 0x146   : > { %v333_v6 = vpop.f32.mrb[0].mxu0 }
 0x147   : > { %v334_v7 = vadd.f32 %v1114_v5, %v333_v6  ;;  %v1168_v8 = vpop.f32.mrb[1].mxu0 }
 0x148   : > { %v336_v9 = vpop.f32.mrb[2].mxu0 }
 0x149   : > { %v1748_v10 = vpack.c.bf16 %v334_v7, %v334_v7  ;;  %v1169_v11 = vpop.f32.mrb[3].mxu0 }
 0x14b   : > { %401 = vrot.lane.b32.xlu1 %v1748_v10, %s1507_s8  ;;  %342 = vrot.lane.b32.xlu0 %v1748_v10, %s1508_s10  ;;  %s268_s8 = scalar_lea.vmem [#allocation9], %s1110_s13  ;;  %s1432_s13 = sshll.u32 %s1518_s22, 4  ;;  %s1433_s13 = int_to_ptr.vmem [resolvable:$false] %s1432_s13 }
 0x14c   : > { %s1013_s10 = sshll.u32 %s268_s8, 4  ;;  %s1839_s10 = int_to_ptr.vmem [resolvable:$true] %s1013_s10 }
 0x14d   : > { %p1435_p7 = scmp.lt.s32.totalorder %s1839_s10, %s1433_s13 }
 0x14f   : > { %505 = vrot.lane.b32.xlu1 %v1748_v10, %s1509_s11 }
 0x153   : > { %503 = vrot.lane.b32.xlu1 %v1748_v10, %s1510_s28 }
 0x1bd   : > { %v402_v12 = vpop.permute.xlu1 %401  ;;  %v343_v13 = vpop.permute.xlu0 %342 }
 0x1be   : > { %v408_v14 = vsel %vm406_vm2, %v402_v12, 0  ;;  %v349_v15 = vsel %vm344_vm3, %v343_v13, 0 }
 0x1bf   : > { %1171 = vmatpush3.bf16.xpose.msra.mxu1 %v349_v15  ;;  %1177 = vmatpush3.bf16.msra.mxu0 %v408_v14 }
 0x1c0   : > { %1188 = vmatprep.subr.bf16.mxu0 %v1505_v0  ;;  %1182 = vmatprep.subr.bf16.mxu1 %v1505_v0 }
 0x1c1   : > { %v506_v25 = vpop.permute.xlu1 %505 }
 0x1c2   : > { %v511_v28 = vsel %vm344_vm3, %v506_v25, 0 }
 0x1c5   : > { %v504_v29 = vpop.permute.xlu1 %503 }
 0x1c6   : > { %1173 = vmatmul.mubr.msk.bf16.vlgmr.msra.gmra.mrb[0].mxu1 %vm344_vm3, %v1748_v10 }
 0x1c7   : > { %1184 = vmatprep.mubr.msk.bf16.mxu1 %vm1506_vm1, %v1505_v0  ;;  %1183 = vmatpush3.bf16.msra.mxu1 %v459_v31 }
 0x1c8   : > { %1194 = vmatprep.subr.bf16.mxu1 %v1505_v0 }
 0x299   : > { %v385_v16 = vpop.f32.mrb[0].mxu1 }
 0x29a   : > { %v1174_v17 = vpop.f32.mrb[1].mxu1  ;;  %v391_v18 = vsel %vm344_vm3, %v385_v16, -inf }
 0x29b   : > { %392 = vmax.xlane.f32.xlu0 %v391_v18  ;;  %v388_v19 = vpop.f32.mrb[2].mxu1 }
 0x29c   : > { %v1175_v20 = vpop.f32.mrb[3].mxu1 }
 0x328   : > { %v393_v21 = vpop.xlane.xlu0 %392 }
 0x329   : > { %v394_v22 = vsub.f32 %v385_v16, %v393_v21 }
 0x32b   : > { %v395_v23 = vmul.f32 1.442695, %v394_v22 }
 0x32d   : > { %1326 = vpow2.f32 %v395_v23 }
 0x337   : > { %v1327_v24 = vpop.eup %1326 }
 0x338   : > { %v397_v26 = vsel %vm344_vm3, %v1327_v24, 0.0  ;;  %v400_v27 = vpack.c.bf16 %v1327_v24, %v1327_v24 }
 0x339   : > { %398 = vadd.xlane.f32.xlu1 %v397_v26 }
 0x33a   : > { %1179 = vmatmul.mubr.msk.bf16.vlgmr.msra.gmra.mrb[4].mxu0 %vm344_vm3, %v400_v27 }
 0x33b   : > { %1189 = vmatpush3.bf16.xpose.msra.mxu0 %v511_v28  ;;  %1190 = vmatprep.mubr.msk.bf16.mxu0 %vm1506_vm1, %v1505_v0 }
 0x33c   : > { %1200 = vmatprep.subr.bf16.mxu0 %v1505_v0 }
 0x342   : > { %1191 = vmatmul.mubr.msk.bf16.vlgmr.msra.gmra.mrb[8].mxu0 %vm344_vm3, %v504_v29 }
 0x343   : > { %1202 = vmatprep.mubr.msk.bf16.mxu0 %vm1506_vm1, %v1505_v0  ;;  %1201 = vmatpush3.bf16.msra.mxu0 %v621_v63 }
 0x344   : > { %1212 = vmatprep.subr.bf16.mxu0 %v1505_v0 }
 0x34a   : > { %667 = vrot.lane.b32.xlu1 %v1748_v10, %s1511_s7  ;;  %s1837_s7 = scalar_lea.hbm %s1887_s5, %s1132_s26 }
 0x3c6   : > { %v399_v32 = vpop.xlane.xlu1 %398 }
 0x3c7   : > { %1328 = vrcp.f32 %v399_v32  ;;  %v778_v32 = vld [vmem:[#allocation8 + $0x8] sm:$0xf] }
 0x3ca   : > { %v668_v51 = vpop.permute.xlu1 %667 }
 0x3cb   : > { %v673_v54 = vsel %vm344_vm3, %v668_v51, 0 }
 0x3d1   : > { %v1329_v33 = vpop.eup %1328 }
 0x40d   : > { %v444_v34 = vpop.f32.mrb[4].mxu0 }
 0x40e   : > { %v451_v35 = vmul.f32 %v1329_v33, %v444_v34  ;;  %v1180_v36 = vpop.f32.mrb[5].mxu0  ;;  %v783_v33 = vsel %vm406_vm2, %v778_v32, 0 }
 0x40f   : > { %v447_v37 = vpop.f32.mrb[6].mxu0 }
 0x410   : > { %v453_v38 = vpack.c.bf16 %v451_v35, %v451_v35  ;;  %v1181_v39 = vpop.f32.mrb[7].mxu0 }
 0x412   : > { %1185 = vmatmul.mubr.msk.bf16.vlgmr.msra.gmra.mrb[4].mxu1 %vm344_vm3, %v453_v38 }
 0x413   : > { %1196 = vmatprep.mubr.msk.bf16.mxu1 %vm1506_vm1, %v1505_v0 }
 0x415   : > { %v547_v40 = vpop.f32.mrb[8].mxu0 }
 0x416   : > { %v1192_v41 = vpop.f32.mrb[9].mxu0  ;;  %v553_v42 = vsel %vm344_vm3, %v547_v40, -inf }
 0x417   : > { %554 = vmax.xlane.f32.xlu0 %v553_v42  ;;  %v550_v43 = vpop.f32.mrb[10].mxu0 }
 0x418   : > { %v1193_v44 = vpop.f32.mrb[11].mxu0 }
 0x42d   : > { %563 = vrot.lane.b32.xlu0 %v1748_v10, %s1512_s6  ;;  %s1000_s6 = scalar_lea.sflag [#allocation5], %s1718_s12 }
 0x431   : > { %665 = vrot.lane.b32.xlu0 %v1748_v10, %s1513_s30  ;;  %s1428_s30 = scalar_lea.vmem %s1839_s10, 128 }
 0x432   : > { %p1429_p11 = scmp.ne.s32.totalorder %s1839_s10, %s1428_s30 }
 0x434   : > { %p1430_p1 = pnand %p1429_p11, %p1901_p0 }
 0x436   : > { %p1431_p3 = pneg %p1430_p1 }
 0x4a4   : > { %v555_v45 = vpop.xlane.xlu0 %554 }
 0x4a5   : > { %v556_v46 = vsub.f32 %v547_v40, %v555_v45 }
 0x4a7   : > { %v557_v47 = vmul.f32 1.442695, %v556_v46 }
 0x4a8   : > { %v564_v48 = vpop.permute.xlu0 %563 }
 0x4a9   : > { %1330 = vpow2.f32 %v557_v47  ;;  %v569_v49 = vsel %vm406_vm2, %v564_v48, 0 }
 0x4aa   : > { %1195 = vmatpush3.bf16.msra.mxu1 %v569_v49 }
 0x4ab   : > { %1206 = vmatprep.subr.bf16.mxu1 %v1505_v0 }
 0x4ac   : > { %v666_v55 = vpop.permute.xlu0 %665 }
 0x4b3   : > { %v1331_v50 = vpop.eup %1330 }
 0x4b4   : > { %v559_v52 = vsel %vm344_vm3, %v1331_v50, 0.0  ;;  %v562_v53 = vpack.c.bf16 %v1331_v50, %v1331_v50 }
 0x4b5   : > { %560 = vadd.xlane.f32.xlu0 %v559_v52 }
 0x4b6   : > { %1197 = vmatmul.mubr.msk.bf16.vlgmr.msra.gmra.mrb[8].mxu1 %vm344_vm3, %v562_v53 }
 0x4b7   : > { %1207 = vmatpush3.bf16.xpose.msra.mxu1 %v673_v54  ;;  %1208 = vmatprep.mubr.msk.bf16.mxu1 %vm1506_vm1, %v1505_v0  ;;  %v940_v54 = vld [vmem:[#allocation8 + $0xc] sm:$0xf] }
 0x4b8   : > { %1218 = vmatprep.subr.bf16.mxu1 %v1505_v0 }
 0x4be   : > { %1209 = vmatmul.mubr.msk.bf16.vlgmr.msra.gmra.mrb[12].mxu1 %vm344_vm3, %v666_v55  ;;  %v945_v55 = vsel %vm406_vm2, %v940_v54, 0 }
 0x4bf   : > { %1220 = vmatprep.mubr.msk.bf16.mxu1 %vm1506_vm1, %v1505_v0  ;;  %1219 = vmatpush3.bf16.msra.mxu1 %v783_v33 }
 0x4c0   : > { %1230 = vmatprep.subr.bf16.mxu1 %v1505_v0 }
 0x4cb   : > { %725 = vrot.lane.b32.xlu0 %v1748_v10, %s1514_s15  ;;  %s1434_s15 = scalar_lea.vmem %s1433_s13, 256 }
 0x4cc   : > { %p1436_p9 = scmp.lt.s32.totalorder %s1434_s15, %s1428_s30 }
 0x4ce   : > { %p1437_p12 = por %p1436_p9, %p1435_p7 }
 0x4cf   : > { %827 = vrot.lane.b32.xlu0 %v1748_v10, %s1515_s16 }
 0x4d0   : > { %p1438_p2 = pnand %p1437_p12, %p1431_p3 }
 0x4e5   : > { %v495_v57 = vpop.f32.mrb[4].mxu1 }
 0x4e6   : > { %v501_v58 = vadd.f32 %v495_v57, %v452_v56  ;;  %v1186_v59 = vpop.f32.mrb[5].mxu1 }
 0x4e7   : > { %v498_v60 = vpop.f32.mrb[6].mxu1 }
 0x4e8   : > { %502 = vst.msk [vmem:[#allocation2] sm:$0xff] %vm295_vm0, %v501_v58  ;;  %v1187_v61 = vpop.f32.mrb[7].mxu1 }
 0x4ef   : > { %v613_v26 = vld [vmem:[#allocation2] sm:$0xff] }
 0x542   : > { %v561_v1 = vpop.xlane.xlu0 %560 }
 0x543   : > { %1332 = vrcp.f32 %v561_v1 }
 0x546   : > { %v726_v6 = vpop.permute.xlu0 %725 }
 0x547   : > { %v731_v11 = vsel %vm406_vm2, %v726_v6, 0 }
 0x54a   : > { %v828_v25 = vpop.permute.xlu0 %827 }
 0x54d   : > { %v1333_v2 = vpop.eup %1332 }
 0x589   : > { %v605_v3 = vpop.f32.mrb[8].mxu1 }
 0x58a   : > { %v612_v4 = vmul.f32 %v1333_v2, %v605_v3  ;;  %v1198_v5 = vpop.f32.mrb[9].mxu1 }
 0x58b   : > { %v608_v7 = vpop.f32.mrb[10].mxu1 }
 0x58c   : > { %v614_v8 = vpack.c.bf16 %v612_v4, %v612_v4  ;;  %v1199_v9 = vpop.f32.mrb[11].mxu1 }
 0x58e   : > { %1203 = vmatmul.mubr.msk.bf16.vlgmr.msra.gmra.mrb[12].mxu0 %vm344_vm3, %v614_v8 }
 0x58f   : > { %1213 = vmatpush3.bf16.msra.mxu0 %v731_v11  ;;  %1214 = vmatprep.mubr.msk.bf16.mxu0 %vm1506_vm1, %v1505_v0 }
 0x590   : > { %1224 = vmatprep.subr.bf16.mxu0 %v1505_v0 }
 0x591   : > { %v709_v12 = vpop.f32.mrb[12].mxu1 }
 0x592   : > { %v1210_v13 = vpop.f32.mrb[13].mxu1  ;;  %v715_v14 = vsel %vm344_vm3, %v709_v12, -inf }
 0x593   : > { %716 = vmax.xlane.f32.xlu1 %v715_v14  ;;  %v712_v15 = vpop.f32.mrb[14].mxu1  ;;  %v1130_v13 = vld [vmem:[%s1886_s4] ss:$0 sm:$0xff] }
 0x594   : > { %v1211_v16 = vpop.f32.mrb[15].mxu1 }
 0x5a4   : > { %829 = vrot.lane.b32.xlu1 %v1748_v10, %s1516_s9 }
 0x620   : > { %v717_v17 = vpop.xlane.xlu1 %716 }
 0x621   : > { %v718_v18 = vsub.f32 %v709_v12, %v717_v17 }
 0x623   : > { %v719_v19 = vmul.f32 1.442695, %v718_v18 }
 0x624   : > { %v830_v21 = vpop.permute.xlu1 %829 }
 0x625   : > { %1334 = vpow2.f32 %v719_v19  ;;  %v835_v24 = vsel %vm344_vm3, %v830_v21, 0 }
 0x62f   : > { %v1335_v20 = vpop.eup %1334 }
 0x630   : > { %v721_v22 = vsel %vm344_vm3, %v1335_v20, 0.0  ;;  %v724_v23 = vpack.c.bf16 %v1335_v20, %v1335_v20 }
 0x631   : > { %722 = vadd.xlane.f32.xlu1 %v721_v22 }
 0x632   : > { %1215 = vmatmul.mubr.msk.bf16.vlgmr.msra.gmra.mrb[16].mxu0 %vm344_vm3, %v724_v23 }
 0x633   : > { %1225 = vmatpush3.bf16.xpose.msra.mxu0 %v835_v24  ;;  %1226 = vmatprep.mubr.msk.bf16.mxu0 %vm1506_vm1, %v1505_v0 }
 0x634   : > { %1236 = vmatprep.subr.bf16.mxu0 %v1505_v0 }
 0x63a   : > { %1227 = vmatmul.mubr.msk.bf16.vlgmr.msra.gmra.mrb[20].mxu0 %vm344_vm3, %v828_v25 }
 0x63b   : > { %1238 = vmatprep.mubr.msk.bf16.mxu0 %vm1506_vm1, %v1505_v0  ;;  %1237 = vmatpush3.bf16.msra.mxu0 %v945_v55 }
 0x661   : > { %v657_v27 = vpop.f32.mrb[12].mxu0 }
 0x662   : > { %v663_v28 = vadd.f32 %v657_v27, %v613_v26  ;;  %v1204_v29 = vpop.f32.mrb[13].mxu0 }
 0x663   : > { %v660_v30 = vpop.f32.mrb[14].mxu0 }
 0x664   : > { %664 = vst.msk [vmem:[#allocation2] sm:$0xff] %vm295_vm0, %v663_v28  ;;  %v1205_v31 = vpop.f32.mrb[15].mxu0 }
 0x6be   : > { %v723_v34 = vpop.xlane.xlu1 %722 }
 0x6bf   : > { %1336 = vrcp.f32 %v723_v34 }
 0x6c9   : > { %v1337_v35 = vpop.eup %1336 }
 0x705   : > { %v767_v36 = vpop.f32.mrb[16].mxu0 }
 0x706   : > { %v774_v37 = vmul.f32 %v1337_v35, %v767_v36  ;;  %v1216_v38 = vpop.f32.mrb[17].mxu0 }
 0x707   : > { %v770_v39 = vpop.f32.mrb[18].mxu0 }
 0x708   : > { %v776_v40 = vpack.c.bf16 %v774_v37, %v774_v37  ;;  %v1217_v41 = vpop.f32.mrb[19].mxu0 }
 0x70a   : > { %1221 = vmatmul.mubr.msk.bf16.vlgmr.msra.gmra.mrb[16].mxu1 %vm344_vm3, %v776_v40 }
 0x70b   : > { %1232 = vmatprep.mubr.msk.bf16.mxu1 %vm1506_vm1, %v1505_v0 }
 0x70d   : > { %v871_v42 = vpop.f32.mrb[20].mxu0 }
 0x70e   : > { %v1228_v43 = vpop.f32.mrb[21].mxu0  ;;  %v877_v44 = vsel %vm344_vm3, %v871_v42, -inf }
 0x70f   : > { %878 = vmax.xlane.f32.xlu0 %v877_v44  ;;  %v874_v45 = vpop.f32.mrb[22].mxu0 }
 0x710   : > { %v1229_v46 = vpop.f32.mrb[23].mxu0 }
 0x725   : > { %887 = vrot.lane.b32.xlu0 %v1748_v10, %s1517_s29  ;;  %v775_v10 = vld [vmem:[#allocation2] sm:$0xff] }
 0x79c   : > { %v879_v47 = vpop.xlane.xlu0 %878 }
 0x79d   : > { %v880_v48 = vsub.f32 %v871_v42, %v879_v47 }
 0x79f   : > { %v881_v49 = vmul.f32 1.442695, %v880_v48 }
 0x7a0   : > { %v888_v50 = vpop.permute.xlu0 %887 }
 0x7a1   : > { %1338 = vpow2.f32 %v881_v49  ;;  %v893_v51 = vsel %vm406_vm2, %v888_v50, 0 }
 0x7a2   : > { %1231 = vmatpush3.bf16.msra.mxu1 %v893_v51 }
 0x7ab   : > { %v1339_v52 = vpop.eup %1338 }
 0x7ac   : > { %v883_v0 = vsel %vm344_vm3, %v1339_v52, 0.0  ;;  %v886_v53 = vpack.c.bf16 %v1339_v52, %v1339_v52 }
 0x7ad   : > { %884 = vadd.xlane.f32.xlu1 %v883_v0 }
 0x7ae   : > { %1233 = vmatmul.mubr.msk.bf16.vlgmr.msra.gmra.mrb[20].mxu1 %vm344_vm3, %v886_v53 }
 0x7dd   : > { %v819_v56 = vpop.f32.mrb[16].mxu1 }
 0x7de   : > { %v825_v57 = vadd.f32 %v819_v56, %v775_v10  ;;  %v1222_v58 = vpop.f32.mrb[17].mxu1 }
 0x7df   : > { %v822_v59 = vpop.f32.mrb[18].mxu1 }
 0x7e0   : > { %826 = vst.msk [vmem:[#allocation2] sm:$0xff] %vm295_vm0, %v825_v57  ;;  %v1223_v60 = vpop.f32.mrb[19].mxu1 }
 0x7e7   : > { %v937_v6 = vld [vmem:[#allocation2] sm:$0xff] }
 0x83a   : > { %v885_v61 = vpop.xlane.xlu1 %884 }
 0x83b   : > { %1340 = vrcp.f32 %v885_v61 }
 0x845   : > { %v1341_v62 = vpop.eup %1340 }
 0x881   : > { %v929_v63 = vpop.f32.mrb[20].mxu1 }
 0x882   : > { %v936_v1 = vmul.f32 %v1341_v62, %v929_v63  ;;  %v1234_v2 = vpop.f32.mrb[21].mxu1 }
 0x883   : > { %v932_v3 = vpop.f32.mrb[22].mxu1 }
 0x884   : > { %v938_v4 = vpack.c.bf16 %v936_v1, %v936_v1  ;;  %v1235_v5 = vpop.f32.mrb[23].mxu1 }
 0x886   : > { %1239 = vmatmul.mubr.msk.bf16.vlgmr.msra.gmra.mrb[24].mxu0 %vm344_vm3, %v938_v4 }
 0x959   : > { %v981_v7 = vpop.f32.mrb[24].mxu0 }
 0x95a   : > { %v987_v8 = vadd.f32 %v981_v7, %v937_v6  ;;  %v1240_v9 = vpop.f32.mrb[25].mxu0 }
 0x95b   : > { %v984_v11 = vpop.f32.mrb[26].mxu0 }
 0x95c   : > { %988 = vst.msk [vmem:[#allocation2] sm:$0xff] %vm295_vm0, %v987_v8  ;;  %v1241_v12 = vpop.f32.mrb[27].mxu0 }
 0x963   : > { %v989_v14 = vld [vmem:[#allocation2] sm:$0xff] }
 0x964   : > { %v997_v15 = vadd.f32 %v1130_v13, %v989_v14 }
 0x966   : > { %998 = vst.msk [vmem:[%s268_s8] sm:$0xff] %vm295_vm0, %v997_v15 }
 0x967   : > { %1441 = shalt.err (!%p1438_p2)
}
 0x968   : > { %s1442_s12 = scalar_lea.hbm %s1837_s7, 128  ;;  %s1446_s29 = scalar_lea.hbm %s1887_s5, 256 }
 0x969   : > { %p1443_p13 = scmp.ne.s32.totalorder %s1837_s7, %s1442_s12  ;;  %p1447_p4 = scmp.lt.u32.totalorder %s1837_s7, %s1887_s5 }
 0x96a   : > { %p1448_p5 = scmp.lt.u32.totalorder %s1446_s29, %s1442_s12  ;;  %p1450_p11 = scmp.lt.u32.totalorder %s1442_s12, %s1837_s7 }
 0x96b   : > { %p1444_p6 = pnand %p1443_p13, %p1901_p0 }
 0x96c   : > { %p1449_p8 = por %p1448_p5, %p1447_p4 }
 0x96d   : > { %p1445_p10 = pneg %p1444_p6 }
 0x96e   : > { %p1451_p1 = por %p1450_p11, %p1449_p8 }
 0x970   : > { %p1452_p3 = pnand %p1451_p1, %p1445_p10 }
 0x972   : > { %1455 = shalt.err (!%p1452_p3)
}
 0x973   : > { %1252 = dma.vmem_to_hbm [thread:$0]  (%p1901_p0), %s1839_s10, 128, %s1837_s7, %s1000_s6  }
 0x974 PF: > { %s1025_s26 = sand.u32 1, %s1486_s18   ;;  %p1902_p7 = scmp.ne.s32.totalorder %s1892_s25, 0 }
 0x975   : > { %p1903_p9 = scmp.ge.s32.totalorder %s1498_s21, 2  ;;  %s1026_s8 = scalar_lea.sflag [#allocation5], %s1025_s26 }
 0x977   : > { %p1266_p12 = pnand %p1903_p9, %p1902_p7 }
 0x979   : > { %1481 = dma.done.wait (!%p1266_p12), %s1026_s8, 128  }
 0x97a   : > { %1483 = vsyncadd (!%p1266_p12), %s1026_s8, 4294967168  ;;  %p19_p2 = scmp.ge.s32.totalorder %s1659_s14, 4   ;;  %s1904_s18 = smov %s1490_s19 }
 0x97b   : > { %s1905_s19 = smov %s1494_s20  ;;  %s1906_s20 = smov %s1675_s27 }
 0x97c   : > { %s1907_s21 = smov %s1659_s14  ;;  %21 = sbr.rel (!%p19_p2) target bundleno = 6 (0x6), region = 96 }
 0x983   :  { %1031 = vsyncpa [#allocation4], 1 }
 0x984   :  { %1033 = vsyncpa [#allocation4 + $0x1], 1 }
 0x985   :  { %1034 = vsyncpa [#allocation7], 1 }
 0x986   :  { %1035 = vsyncpa [#allocation5], 1 }
 0x987   :  { %1037 = vsyncpa [#allocation5 + $0x1], 1 }

// kernel: tpu_custom_call.1
= control target key start
LH: loop header
LB: loop body
LE: loop exit
PB: predicated region body
PF: predicated region fallthrough
CT: control target
= control target key end

     0   :  { %10 = vsyncpa [#allocation4], 0  ;;  %s1882_s0 = inlined_call_operand.hbm [shape: f32[2,8,32], index: 0, kind: input, shape index: {}]   ;;  %s1883_s1 = inlined_call_operand.hbm [shape: bf16[32,96], index: 1, kind: input, shape index: {}]   ;;  %s1884_s2 = inlined_call_operand.vmem [shape: f32[1,96], index: 2, kind: input, shape index: {}]   ;;  %s1885_s3 = inlined_call_operand.hbm [shape: bf16[4,8,32], index: 3, kind: input, shape index: {}]   ;;  %s1886_s4 = inlined_call_operand.vmem [shape: f32[1,32], index: 4, kind: input, shape index: {}]   ;;  %s1887_s5 = inlined_call_operand.hbm [shape: f32[2,8,32], index: 5, kind: output, shape index: {}]  }
   0x1   :  { %12 = vsyncpa [#allocation4 + $0x1], 0 }
   0x2   :  { %13 = vsyncpa [#allocation7], 0 }
   0x3   :  { %14 = vsyncpa [#allocation5], 0 }
   0x4   :  { %16 = vsyncpa [#allocation5 + $0x1], 0  ;;  %s1549_s18 = smov 0   ;;  %s1551_s19 = smov 0  }
   0x5   :  { %s1553_s20 = smov 0   ;;  %s1555_s21 = smov 0  }
   0x6 LB: > { %s1570_s22 = sadd.s32 4294967295, %s1498_s21   ;;  %s1102_s23 = sadd.s32 4294967294, %s1498_s21   ;;  %s1498_s21 = sphi %s1555_s21, %s1907_s21   ;;  %s1494_s20 = sphi %s1553_s20, %s1906_s20   ;;  %s1490_s19 = sphi %s1551_s19, %s1905_s19   ;;  %s1486_s18 = sphi %s1549_s18, %s1904_s18  }
   0x7   : > { %p42_p0 = scmp.ne.s32.totalorder %s1490_s19, %s1486_s18  ;;  %p1888_p1 = scmp.eq.s32.totalorder %s1570_s22, 0 }
   0x8   : > { %p156_p3 = scmp.eq.s32.totalorder %s1102_s23, 1  ;;  %p1103_p5 = scmp.ge.s32.totalorder %s1498_s21, 1 }
   0x9   : > { %p1579_p4 = por %p1888_p1, %p42_p0  ;;  %p163_p7 = scmp.lt.s32.totalorder %s1498_s21, 3 }
   0xa   : > { %p1584_p6 = por %p156_p3, %p42_p0  ;;  %s1500_s27 = smov [#allocation6]  }
   0xb   : > { %s1891_s24 = scalar_select %p1579_p4, 1, 0 }
   0xc   : > { %s1892_s25 = scalar_select %p1584_p6, 1, 0 }
   0xd   : > { %p1589_p8 = pnand %p1103_p5, %p163_p7  ;;  %s175_s28 = sshll.u32 %s1500_s27, 4  ;;  %s1593_s28 = int_to_ptr.vmem [resolvable:$true] %s175_s28 }
   0xe   : > { %s1501_s30 = smov [#allocation8]   ;;  %s1342_s9 = scalar_lea.hbm %s1883_s1, 256 }
   0xf   : > { %p1254_p9 = pneg %p1589_p8  ;;  %s191_s6 = sshll.u32 %s1501_s30, 4  ;;  %s1604_s6 = int_to_ptr.vmem [resolvable:$true] %s191_s6 }
  0x10   : > { %p1343_p12 = scmp.ne.s32.totalorder %s1883_s1, %s1342_s9  ;;  %p1349_p5 = scmp.lt.u32.totalorder %s1342_s9, %s1883_s1 }
  0x11   : > { %p1600_p11 = pnand %p1254_p9, %p1888_p1 }
  0x13   : > { %p1344_p13 = pneg %p1600_p11 }
  0x15   : > { %p1345_p0 = pnand %p1344_p13, %p1343_p12 }
  0x17   : > { %p1346_p3 = pneg %p1345_p0 }
  0x19   : > { %p1351_p7 = pnand %p1349_p5, %p1346_p3 }
  0x1b   : > { %1354 = shalt.err (!%p1351_p7)
}
  0x1c   : > { %s1355_s14 = scalar_lea.vmem %s1593_s28, 256  ;;  %p1363_p2 = scmp.lt.s32.totalorder %s1593_s28, %s1593_s28 }
  0x1d   : > { %p1356_p9 = scmp.ne.s32.totalorder %s1593_s28, %s1355_s14  ;;  %p1364_p12 = scmp.lt.s32.totalorder %s1355_s14, %s1355_s14 }
  0x1f   : > { %p1358_p10 = pnand %p1356_p9, %p1344_p13  ;;  %p1365_p0 = por %p1364_p12, %p1363_p2 }
  0x21   : > { %p1359_p1 = pneg %p1358_p10 }
  0x23   : > { %p1366_p6 = pnand %p1365_p0, %p1359_p1 }
  0x25   : > { %1369 = shalt.err (!%p1366_p6)
}
  0x26   : > { %s1502_s15 = smov 64   ;;  %s1503_s16 = smov 4  }
  0x27   : > { %1257 = dma.hbm_to_vmem [thread:$0]  (!%p1600_p11), %s1883_s1, 256, %s1593_s28, [#allocation7], %s1502_s15, %s1502_s15, %s1503_s16  }
  0x28   : > { %s1370_s7 = scalar_lea.hbm %s1885_s3, 256 }
  0x29   : > { %p1371_p2 = scmp.ne.s32.totalorder %s1885_s3, %s1370_s7  ;;  %p1377_p10 = scmp.lt.u32.totalorder %s1370_s7, %s1885_s3 }
  0x2b   : > { %p1373_p1 = pnand %p1371_p2, %p1344_p13 }
  0x2d   : > { %p1374_p6 = pneg %p1373_p1 }
  0x2f   : > { %p1379_p3 = pnand %p1377_p10, %p1374_p6 }
  0x31   : > { %1382 = shalt.err (!%p1379_p3)
}
  0x32   : > { %s1383_s28 = scalar_lea.vmem %s1604_s6, 256  ;;  %p1391_p12 = scmp.lt.s32.totalorder %s1604_s6, %s1604_s6 }
  0x33   : > { %p1384_p5 = scmp.ne.s32.totalorder %s1604_s6, %s1383_s28  ;;  %p1392_p0 = scmp.lt.s32.totalorder %s1383_s28, %s1383_s28 }
  0x35   : > { %p1386_p7 = pnand %p1384_p5, %p1344_p13  ;;  %p1393_p2 = por %p1392_p0, %p1391_p12 }
  0x37   : > { %p1387_p9 = pneg %p1386_p7 }
  0x39   : > { %p1394_p1 = pnand %p1393_p2, %p1387_p9 }
  0x3b   : > { %1397 = shalt.err (!%p1394_p1)
}
  0x3c   : > { %1260 = dma.hbm_to_vmem [thread:$0]  (!%p1600_p11), %s1885_s3, 256, %s1604_s6, [#allocation7], %s1502_s15, %s1502_s15, %s1503_s16  }
  0x3d   : > { %s1659_s14 = sadd.s32 1, %s1498_s21   ;;  %s29_s29 = sadd.s32 1, %s1494_s20 }
  0x3e   : > { %s26_s17 = ssub.s32 %s1498_s21, %s1659_s14  ;;  %p36_p13 = scmp.ne.s32.totalorder %s1494_s20, %s1490_s19 }
  0x3f   : > { %p27_p6 = scmp.eq.s32.totalorder %s26_s17, 0  ;;  %p37_p10 = scmp.eq.s32.totalorder %s1498_s21, 0 }
  0x40   : > { %p1895_p3 = scmp.eq.s32.totalorder %s1570_s22, 1  ;;  %p1271_p7 = scmp.lt.s32.totalorder %s1498_s21, 2 }
  0x41   : > { %s1675_s27 = scalar_select %p27_p6, %s1494_s20, %s29_s29  }
  0x42   : > { %p1669_p5 = por %p1895_p3, %p36_p13  ;;  %p38_p9 = por %p37_p10, %p36_p13 }
  0x43   : > { %s208_s30 = sand.u32 1, %s1494_s20   ;;  %s1108_s6 = sshll.u32 %s1498_s21, 7 }
  0x44   : > { %s1896_s23 = scalar_select %p1669_p5, 1, 0 }
  0x45   : > { %s1107_s7 = sshll.u32 %s208_s30, 3  ;;  %s1682_s8 = scalar_lea.hbm %s1882_s0, %s1108_s6 }
  0x46   : > { %s212_s9 = scalar_lea.vmem [#allocation3], %s1107_s7  ;;  %p1686_p11 = pnand %p1271_p7, %p38_p9 }
  0x47   : > { %s219_s10 = sshll.u32 %s212_s9, 4  ;;  %s209_s28 = scalar_lea.sflag [#allocation4], %s208_s30  ;;  %s1684_s10 = int_to_ptr.vmem [resolvable:$true] %s219_s10 }
  0x48   : > { %s1398_s12 = scalar_lea.hbm %s1682_s8, 128  ;;  %p1400_p0 = pneg %p1686_p11 }
  0x49   : > { %p1399_p12 = scmp.ne.s32.totalorder %s1682_s8, %s1398_s12  ;;  %s1403_s17 = scalar_lea.hbm %s1882_s0, 256 }
  0x4a   : > { %p1404_p13 = scmp.lt.u32.totalorder %s1682_s8, %s1882_s0  ;;  %p1405_p6 = scmp.lt.u32.totalorder %s1403_s17, %s1398_s12 }
  0x4b   : > { %p1401_p2 = pnand %p1400_p0, %p1399_p12  ;;  %p1407_p3 = scmp.lt.u32.totalorder %s1398_s12, %s1682_s8 }
  0x4c   : > { %p1406_p10 = por %p1405_p6, %p1404_p13 }
  0x4d   : > { %p1402_p1 = pneg %p1401_p2 }
  0x4e   : > { %p1408_p7 = por %p1407_p3, %p1406_p10 }
  0x50   : > { %p1409_p9 = pnand %p1408_p7, %p1402_p1 }
  0x52   : > { %1412 = shalt.err (!%p1409_p9)
}
  0x53   : > { %s1413_s30 = scalar_lea.vmem %s1684_s10, 128  ;;  %s1504_s15 = smov [#allocation3]  }
  0x54   : > { %p1414_p12 = scmp.ne.s32.totalorder %s1684_s10, %s1413_s30  ;;  %s1418_s16 = sshll.u32 %s1504_s15, 4  ;;  %s1419_s16 = int_to_ptr.vmem [resolvable:$false] %s1418_s16 }
  0x55   : > { %s1420_s9 = scalar_lea.vmem %s1419_s16, 256  ;;  %p1421_p4 = scmp.lt.s32.totalorder %s1684_s10, %s1419_s16 }
  0x56   : > { %p1416_p2 = pnand %p1414_p12, %p1400_p0  ;;  %p1422_p13 = scmp.lt.s32.totalorder %s1420_s9, %s1413_s30 }
  0x58   : > { %p1417_p5 = pneg %p1416_p2  ;;  %p1423_p6 = por %p1422_p13, %p1421_p4 }
  0x5a   : > { %p1424_p10 = pnand %p1423_p6, %p1417_p5 }
  0x5c   : > { %1427 = shalt.err (!%p1424_p10)
}
  0x5d   : > { %1264 = dma.hbm_to_vmem [thread:$0]  (!%p1686_p11), %s1682_s8, 128, %s1684_s10, %s209_s28  }
  0x5e   : > { %228 = sbr.rel (%p1589_p8) target bundleno = 2420 (0x974), region = 40  ;;  %s1718_s12 = sand.u32 (!%p1589_p8), 1, %s1490_s19  }
  0x5f   : > { %s1110_s13 = sshll.u32 (!%p1589_p8), %s1718_s12, 3  ;;  %s231_s29 = scalar_lea.sflag (!%p1589_p8), [#allocation4], %s1718_s12 }
  0x60   : > { %s234_s17 = scalar_lea.vmem (!%p1589_p8), [#allocation3], %s1110_s13  ;;  %p1898_p4 = scmp.ne.s32.totalorder (!%p1589_p8), %s1891_s24, 0 }
  0x65   : > { %1473 = dma.done.wait (%p1898_p4), %s231_s29, 128  }
  0x66   : > { %1475 = vsyncadd (%p1898_p4), %s231_s29, 4294967168  ;;  %p1899_p5 = scmp.eq.s32.totalorder %s1570_s22, 0 }
  0x68   : > { %1477 = dma.done.wait (%p1899_p5), [#allocation7], 512   ;;  %p1900_p8 = pmov %p1899_p5 }
  0x69   : > { %vm295_vm0 = vcmask 261120   ;;  %v1505_v0 = vmov 0.0   ;;  %vm1506_vm1 = vmmov 0   ;;  %v1324_v1 = vld [vmem:[#allocation6] sm:$0xff]   ;;  %v1325_v2 = vld [vmem:[#allocation6 + $0x8] sm:$0xff]   ;;  %v270_v3 = vld [vmem:[%s234_s17] sm:$0xff] }
  0x6a   : > { %1479 = vsyncadd (%p1900_p8), [#allocation7], 4294966784  ;;  %1162 = vmatprep.subr.bf16.mxu0 %v1505_v0  ;;  %1166 = vmatprep.mubr.msk.bf16.mxu0 %vm1506_vm1, %v1505_v0  ;;  %340 = vst.msk [vmem:[#allocation2] sm:$0xff] %vm295_vm0, %v1505_v0  ;;  %v271_v4 = vpack.c.bf16 %v270_v3, %v270_v3  ;;  %v1114_v5 = vld [vmem:[%s1884_s2] ss:$0 sm:$0xff]  ;;  %s1507_s8 = smov 64  }
  0x6b   : > { %1170 = vmatprep.subr.bf16.mxu1 %v1505_v0  ;;  %1172 = vmatprep.mubr.msk.bf16.mxu1 %vm1506_vm1, %v1505_v0  ;;  %s1508_s10 = smov 96   ;;  %s1509_s11 = smov 88   ;;  %vm406_vm2 = vcmask 1043456   ;;  %vm344_vm3 = vcmask 64512   ;;  %v454_v30 = vld [vmem:[#allocation8] sm:$0xf] }
  0x6c   : > { %1163 = vmatpush3.bf16.msra.mxu0 %v1324_v1  ;;  %s1510_s28 = smov 120   ;;  %s1511_s7 = smov 80   ;;  %v459_v31 = vsel %vm406_vm2, %v454_v30, 0  ;;  %v616_v62 = vld [vmem:[#allocation8 + $0x4] sm:$0xf] }
  0x6d   : > { %1164 = vmatprep.subr.bf16.mxu0 %v1505_v0  ;;  %s1512_s6 = smov 56   ;;  %s1513_s30 = smov 112   ;;  %v621_v63 = vsel %vm406_vm2, %v616_v62, 0 }
  0x6e   : > { %s1514_s15 = smov 48   ;;  %s1515_s16 = smov 104  }
  0x6f   : > { %s1516_s9 = smov 72   ;;  %s1517_s29 = smov 40  }
  0x70   : > { %1165 = vmatpush3.bf16.msra.mxu0 %v1325_v2  ;;  %s1132_s26 = sshll.u32 %s1570_s22, 7  ;;  %p1901_p0 = scmp.ne.s32.totalorder %s1896_s23, 0 }
  0x71   : > { %1176 = vmatprep.subr.bf16.mxu0 %v1505_v0  ;;  %v452_v56 = vld [vmem:[#allocation2] sm:$0xff]  ;;  %s1518_s22 = smov [#allocation9]  }
  0x73   : > { %1167 = vmatmul.mubr.msk.bf16.vlgmr.msra.gmra.mrb[0].mxu0 %vm295_vm0, %v271_v4 }
  0x74   : > { %1178 = vmatprep.mubr.msk.bf16.mxu0 %vm1506_vm1, %v1505_v0 }
 0x146   : > { %v333_v6 = vpop.f32.mrb[0].mxu0 }
 0x147   : > { %v334_v7 = vadd.f32 %v1114_v5, %v333_v6  ;;  %v1168_v8 = vpop.f32.mrb[1].mxu0 }
 0x148   : > { %v336_v9 = vpop.f32.mrb[2].mxu0 }
 0x149   : > { %v1748_v10 = vpack.c.bf16 %v334_v7, %v334_v7  ;;  %v1169_v11 = vpop.f32.mrb[3].mxu0 }
 0x14b   : > { %401 = vrot.lane.b32.xlu1 %v1748_v10, %s1507_s8  ;;  %342 = vrot.lane.b32.xlu0 %v1748_v10, %s1508_s10  ;;  %s268_s8 = scalar_lea.vmem [#allocation9], %s1110_s13  ;;  %s1432_s13 = sshll.u32 %s1518_s22, 4  ;;  %s1433_s13 = int_to_ptr.vmem [resolvable:$false] %s1432_s13 }
 0x14c   : > { %s1013_s10 = sshll.u32 %s268_s8, 4  ;;  %s1839_s10 = int_to_ptr.vmem [resolvable:$true] %s1013_s10 }
 0x14d   : > { %p1435_p7 = scmp.lt.s32.totalorder %s1839_s10, %s1433_s13 }
 0x14f   : > { %505 = vrot.lane.b32.xlu1 %v1748_v10, %s1509_s11 }
 0x153   : > { %503 = vrot.lane.b32.xlu1 %v1748_v10, %s1510_s28 }
 0x1bd   : > { %v402_v12 = vpop.permute.xlu1 %401  ;;  %v343_v13 = vpop.permute.xlu0 %342 }
 0x1be   : > { %v408_v14 = vsel %vm406_vm2, %v402_v12, 0  ;;  %v349_v15 = vsel %vm344_vm3, %v343_v13, 0 }
 0x1bf   : > { %1171 = vmatpush3.bf16.xpose.msra.mxu1 %v349_v15  ;;  %1177 = vmatpush3.bf16.msra.mxu0 %v408_v14 }
 0x1c0   : > { %1188 = vmatprep.subr.bf16.mxu0 %v1505_v0  ;;  %1182 = vmatprep.subr.bf16.mxu1 %v1505_v0 }
 0x1c1   : > { %v506_v25 = vpop.permute.xlu1 %505 }
 0x1c2   : > { %v511_v28 = vsel %vm344_vm3, %v506_v25, 0 }
 0x1c5   : > { %v504_v29 = vpop.permute.xlu1 %503 }
 0x1c6   : > { %1173 = vmatmul.mubr.msk.bf16.vlgmr.msra.gmra.mrb[0].mxu1 %vm344_vm3, %v1748_v10 }
 0x1c7   : > { %1184 = vmatprep.mubr.msk.bf16.mxu1 %vm1506_vm1, %v1505_v0  ;;  %1183 = vmatpush3.bf16.msra.mxu1 %v459_v31 }
 0x1c8   : > { %1194 = vmatprep.subr.bf16.mxu1 %v1505_v0 }
 0x299   : > { %v385_v16 = vpop.f32.mrb[0].mxu1 }
 0x29a   : > { %v1174_v17 = vpop.f32.mrb[1].mxu1  ;;  %v391_v18 = vsel %vm344_vm3, %v385_v16, -inf }
 0x29b   : > { %392 = vmax.xlane.f32.xlu0 %v391_v18  ;;  %v388_v19 = vpop.f32.mrb[2].mxu1 }
 0x29c   : > { %v1175_v20 = vpop.f32.mrb[3].mxu1 }
 0x328   : > { %v393_v21 = vpop.xlane.xlu0 %392 }
 0x329   : > { %v394_v22 = vsub.f32 %v385_v16, %v393_v21 }
 0x32b   : > { %v395_v23 = vmul.f32 1.442695, %v394_v22 }
 0x32d   : > { %1326 = vpow2.f32 %v395_v23 }
 0x337   : > { %v1327_v24 = vpop.eup %1326 }
 0x338   : > { %v397_v26 = vsel %vm344_vm3, %v1327_v24, 0.0  ;;  %v400_v27 = vpack.c.bf16 %v1327_v24, %v1327_v24 }
 0x339   : > { %398 = vadd.xlane.f32.xlu1 %v397_v26 }
 0x33a   : > { %1179 = vmatmul.mubr.msk.bf16.vlgmr.msra.gmra.mrb[4].mxu0 %vm344_vm3, %v400_v27 }
 0x33b   : > { %1189 = vmatpush3.bf16.xpose.msra.mxu0 %v511_v28  ;;  %1190 = vmatprep.mubr.msk.bf16.mxu0 %vm1506_vm1, %v1505_v0 }
 0x33c   : > { %1200 = vmatprep.subr.bf16.mxu0 %v1505_v0 }
 0x342   : > { %1191 = vmatmul.mubr.msk.bf16.vlgmr.msra.gmra.mrb[8].mxu0 %vm344_vm3, %v504_v29 }
 0x343   : > { %1202 = vmatprep.mubr.msk.bf16.mxu0 %vm1506_vm1, %v1505_v0  ;;  %1201 = vmatpush3.bf16.msra.mxu0 %v621_v63 }
 0x344   : > { %1212 = vmatprep.subr.bf16.mxu0 %v1505_v0 }
 0x34a   : > { %667 = vrot.lane.b32.xlu1 %v1748_v10, %s1511_s7  ;;  %s1837_s7 = scalar_lea.hbm %s1887_s5, %s1132_s26 }
 0x3c6   : > { %v399_v32 = vpop.xlane.xlu1 %398 }
 0x3c7   : > { %1328 = vrcp.f32 %v399_v32  ;;  %v778_v32 = vld [vmem:[#allocation8 + $0x8] sm:$0xf] }
 0x3ca   : > { %v668_v51 = vpop.permute.xlu1 %667 }
 0x3cb   : > { %v673_v54 = vsel %vm344_vm3, %v668_v51, 0 }
 0x3d1   : > { %v1329_v33 = vpop.eup %1328 }
 0x40d   : > { %v444_v34 = vpop.f32.mrb[4].mxu0 }
 0x40e   : > { %v451_v35 = vmul.f32 %v1329_v33, %v444_v34  ;;  %v1180_v36 = vpop.f32.mrb[5].mxu0  ;;  %v783_v33 = vsel %vm406_vm2, %v778_v32, 0 }
 0x40f   : > { %v447_v37 = vpop.f32.mrb[6].mxu0 }
 0x410   : > { %v453_v38 = vpack.c.bf16 %v451_v35, %v451_v35  ;;  %v1181_v39 = vpop.f32.mrb[7].mxu0 }
 0x412   : > { %1185 = vmatmul.mubr.msk.bf16.vlgmr.msra.gmra.mrb[4].mxu1 %vm344_vm3, %v453_v38 }
 0x413   : > { %1196 = vmatprep.mubr.msk.bf16.mxu1 %vm1506_vm1, %v1505_v0 }
 0x415   : > { %v547_v40 = vpop.f32.mrb[8].mxu0 }
 0x416   : > { %v1192_v41 = vpop.f32.mrb[9].mxu0  ;;  %v553_v42 = vsel %vm344_vm3, %v547_v40, -inf }
 0x417   : > { %554 = vmax.xlane.f32.xlu0 %v553_v42  ;;  %v550_v43 = vpop.f32.mrb[10].mxu0 }
 0x418   : > { %v1193_v44 = vpop.f32.mrb[11].mxu0 }
 0x42d   : > { %563 = vrot.lane.b32.xlu0 %v1748_v10, %s1512_s6  ;;  %s1000_s6 = scalar_lea.sflag [#allocation5], %s1718_s12 }
 0x431   : > { %665 = vrot.lane.b32.xlu0 %v1748_v10, %s1513_s30  ;;  %s1428_s30 = scalar_lea.vmem %s1839_s10, 128 }
 0x432   : > { %p1429_p11 = scmp.ne.s32.totalorder %s1839_s10, %s1428_s30 }
 0x434   : > { %p1430_p1 = pnand %p1429_p11, %p1901_p0 }
 0x436   : > { %p1431_p3 = pneg %p1430_p1 }
 0x4a4   : > { %v555_v45 = vpop.xlane.xlu0 %554 }
 0x4a5   : > { %v556_v46 = vsub.f32 %v547_v40, %v555_v45 }
 0x4a7   : > { %v557_v47 = vmul.f32 1.442695, %v556_v46 }
 0x4a8   : > { %v564_v48 = vpop.permute.xlu0 %563 }
 0x4a9   : > { %1330 = vpow2.f32 %v557_v47  ;;  %v569_v49 = vsel %vm406_vm2, %v564_v48, 0 }
 0x4aa   : > { %1195 = vmatpush3.bf16.msra.mxu1 %v569_v49 }
 0x4ab   : > { %1206 = vmatprep.subr.bf16.mxu1 %v1505_v0 }
 0x4ac   : > { %v666_v55 = vpop.permute.xlu0 %665 }
 0x4b3   : > { %v1331_v50 = vpop.eup %1330 }
 0x4b4   : > { %v559_v52 = vsel %vm344_vm3, %v1331_v50, 0.0  ;;  %v562_v53 = vpack.c.bf16 %v1331_v50, %v1331_v50 }
 0x4b5   : > { %560 = vadd.xlane.f32.xlu0 %v559_v52 }
 0x4b6   : > { %1197 = vmatmul.mubr.msk.bf16.vlgmr.msra.gmra.mrb[8].mxu1 %vm344_vm3, %v562_v53 }
 0x4b7   : > { %1207 = vmatpush3.bf16.xpose.msra.mxu1 %v673_v54  ;;  %1208 = vmatprep.mubr.msk.bf16.mxu1 %vm1506_vm1, %v1505_v0  ;;  %v940_v54 = vld [vmem:[#allocation8 + $0xc] sm:$0xf] }
 0x4b8   : > { %1218 = vmatprep.subr.bf16.mxu1 %v1505_v0 }
 0x4be   : > { %1209 = vmatmul.mubr.msk.bf16.vlgmr.msra.gmra.mrb[12].mxu1 %vm344_vm3, %v666_v55  ;;  %v945_v55 = vsel %vm406_vm2, %v940_v54, 0 }
 0x4bf   : > { %1220 = vmatprep.mubr.msk.bf16.mxu1 %vm1506_vm1, %v1505_v0  ;;  %1219 = vmatpush3.bf16.msra.mxu1 %v783_v33 }
 0x4c0   : > { %1230 = vmatprep.subr.bf16.mxu1 %v1505_v0 }
 0x4cb   : > { %725 = vrot.lane.b32.xlu0 %v1748_v10, %s1514_s15  ;;  %s1434_s15 = scalar_lea.vmem %s1433_s13, 256 }
 0x4cc   : > { %p1436_p9 = scmp.lt.s32.totalorder %s1434_s15, %s1428_s30 }
 0x4ce   : > { %p1437_p12 = por %p1436_p9, %p1435_p7 }
 0x4cf   : > { %827 = vrot.lane.b32.xlu0 %v1748_v10, %s1515_s16 }
 0x4d0   : > { %p1438_p2 = pnand %p1437_p12, %p1431_p3 }
 0x4e5   : > { %v495_v57 = vpop.f32.mrb[4].mxu1 }
 0x4e6   : > { %v501_v58 = vadd.f32 %v495_v57, %v452_v56  ;;  %v1186_v59 = vpop.f32.mrb[5].mxu1 }
 0x4e7   : > { %v498_v60 = vpop.f32.mrb[6].mxu1 }
 0x4e8   : > { %502 = vst.msk [vmem:[#allocation2] sm:$0xff] %vm295_vm0, %v501_v58  ;;  %v1187_v61 = vpop.f32.mrb[7].mxu1 }
 0x4ef   : > { %v613_v26 = vld [vmem:[#allocation2] sm:$0xff] }
 0x542   : > { %v561_v1 = vpop.xlane.xlu0 %560 }
 0x543   : > { %1332 = vrcp.f32 %v561_v1 }
 0x546   : > { %v726_v6 = vpop.permute.xlu0 %725 }
 0x547   : > { %v731_v11 = vsel %vm406_vm2, %v726_v6, 0 }
 0x54a   : > { %v828_v25 = vpop.permute.xlu0 %827 }
 0x54d   : > { %v1333_v2 = vpop.eup %1332 }
 0x589   : > { %v605_v3 = vpop.f32.mrb[8].mxu1 }
 0x58a   : > { %v612_v4 = vmul.f32 %v1333_v2, %v605_v3  ;;  %v1198_v5 = vpop.f32.mrb[9].mxu1 }
 0x58b   : > { %v608_v7 = vpop.f32.mrb[10].mxu1 }
 0x58c   : > { %v614_v8 = vpack.c.bf16 %v612_v4, %v612_v4  ;;  %v1199_v9 = vpop.f32.mrb[11].mxu1 }
 0x58e   : > { %1203 = vmatmul.mubr.msk.bf16.vlgmr.msra.gmra.mrb[12].mxu0 %vm344_vm3, %v614_v8 }
 0x58f   : > { %1213 = vmatpush3.bf16.msra.mxu0 %v731_v11  ;;  %1214 = vmatprep.mubr.msk.bf16.mxu0 %vm1506_vm1, %v1505_v0 }
 0x590   : > { %1224 = vmatprep.subr.bf16.mxu0 %v1505_v0 }
 0x591   : > { %v709_v12 = vpop.f32.mrb[12].mxu1 }
 0x592   : > { %v1210_v13 = vpop.f32.mrb[13].mxu1  ;;  %v715_v14 = vsel %vm344_vm3, %v709_v12, -inf }
 0x593   : > { %716 = vmax.xlane.f32.xlu1 %v715_v14  ;;  %v712_v15 = vpop.f32.mrb[14].mxu1  ;;  %v1130_v13 = vld [vmem:[%s1886_s4] ss:$0 sm:$0xff] }
 0x594   : > { %v1211_v16 = vpop.f32.mrb[15].mxu1 }
 0x5a4   : > { %829 = vrot.lane.b32.xlu1 %v1748_v10, %s1516_s9 }
 0x620   : > { %v717_v17 = vpop.xlane.xlu1 %716 }
 0x621   : > { %v718_v18 = vsub.f32 %v709_v12, %v717_v17 }
 0x623   : > { %v719_v19 = vmul.f32 1.442695, %v718_v18 }
 0x624   : > { %v830_v21 = vpop.permute.xlu1 %829 }
 0x625   : > { %1334 = vpow2.f32 %v719_v19  ;;  %v835_v24 = vsel %vm344_vm3, %v830_v21, 0 }
 0x62f   : > { %v1335_v20 = vpop.eup %1334 }
 0x630   : > { %v721_v22 = vsel %vm344_vm3, %v1335_v20, 0.0  ;;  %v724_v23 = vpack.c.bf16 %v1335_v20, %v1335_v20 }
 0x631   : > { %722 = vadd.xlane.f32.xlu1 %v721_v22 }
 0x632   : > { %1215 = vmatmul.mubr.msk.bf16.vlgmr.msra.gmra.mrb[16].mxu0 %vm344_vm3, %v724_v23 }
 0x633   : > { %1225 = vmatpush3.bf16.xpose.msra.mxu0 %v835_v24  ;;  %1226 = vmatprep.mubr.msk.bf16.mxu0 %vm1506_vm1, %v1505_v0 }
 0x634   : > { %1236 = vmatprep.subr.bf16.mxu0 %v1505_v0 }
 0x63a   : > { %1227 = vmatmul.mubr.msk.bf16.vlgmr.msra.gmra.mrb[20].mxu0 %vm344_vm3, %v828_v25 }
 0x63b   : > { %1238 = vmatprep.mubr.msk.bf16.mxu0 %vm1506_vm1, %v1505_v0  ;;  %1237 = vmatpush3.bf16.msra.mxu0 %v945_v55 }
 0x661   : > { %v657_v27 = vpop.f32.mrb[12].mxu0 }
 0x662   : > { %v663_v28 = vadd.f32 %v657_v27, %v613_v26  ;;  %v1204_v29 = vpop.f32.mrb[13].mxu0 }
 0x663   : > { %v660_v30 = vpop.f32.mrb[14].mxu0 }
 0x664   : > { %664 = vst.msk [vmem:[#allocation2] sm:$0xff] %vm295_vm0, %v663_v28  ;;  %v1205_v31 = vpop.f32.mrb[15].mxu0 }
 0x6be   : > { %v723_v34 = vpop.xlane.xlu1 %722 }
 0x6bf   : > { %1336 = vrcp.f32 %v723_v34 }
 0x6c9   : > { %v1337_v35 = vpop.eup %1336 }
 0x705   : > { %v767_v36 = vpop.f32.mrb[16].mxu0 }
 0x706   : > { %v774_v37 = vmul.f32 %v1337_v35, %v767_v36  ;;  %v1216_v38 = vpop.f32.mrb[17].mxu0 }
 0x707   : > { %v770_v39 = vpop.f32.mrb[18].mxu0 }
 0x708   : > { %v776_v40 = vpack.c.bf16 %v774_v37, %v774_v37  ;;  %v1217_v41 = vpop.f32.mrb[19].mxu0 }
 0x70a   : > { %1221 = vmatmul.mubr.msk.bf16.vlgmr.msra.gmra.mrb[16].mxu1 %vm344_vm3, %v776_v40 }
 0x70b   : > { %1232 = vmatprep.mubr.msk.bf16.mxu1 %vm1506_vm1, %v1505_v0 }
 0x70d   : > { %v871_v42 = vpop.f32.mrb[20].mxu0 }
 0x70e   : > { %v1228_v43 = vpop.f32.mrb[21].mxu0  ;;  %v877_v44 = vsel %vm344_vm3, %v871_v42, -inf }
 0x70f   : > { %878 = vmax.xlane.f32.xlu0 %v877_v44  ;;  %v874_v45 = vpop.f32.mrb[22].mxu0 }
 0x710   : > { %v1229_v46 = vpop.f32.mrb[23].mxu0 }
 0x725   : > { %887 = vrot.lane.b32.xlu0 %v1748_v10, %s1517_s29  ;;  %v775_v10 = vld [vmem:[#allocation2] sm:$0xff] }
 0x79c   : > { %v879_v47 = vpop.xlane.xlu0 %878 }
 0x79d   : > { %v880_v48 = vsub.f32 %v871_v42, %v879_v47 }
 0x79f   : > { %v881_v49 = vmul.f32 1.442695, %v880_v48 }
 0x7a0   : > { %v888_v50 = vpop.permute.xlu0 %887 }
 0x7a1   : > { %1338 = vpow2.f32 %v881_v49  ;;  %v893_v51 = vsel %vm406_vm2, %v888_v50, 0 }
 0x7a2   : > { %1231 = vmatpush3.bf16.msra.mxu1 %v893_v51 }
 0x7ab   : > { %v1339_v52 = vpop.eup %1338 }
 0x7ac   : > { %v883_v0 = vsel %vm344_vm3, %v1339_v52, 0.0  ;;  %v886_v53 = vpack.c.bf16 %v1339_v52, %v1339_v52 }
 0x7ad   : > { %884 = vadd.xlane.f32.xlu1 %v883_v0 }
 0x7ae   : > { %1233 = vmatmul.mubr.msk.bf16.vlgmr.msra.gmra.mrb[20].mxu1 %vm344_vm3, %v886_v53 }
 0x7dd   : > { %v819_v56 = vpop.f32.mrb[16].mxu1 }
 0x7de   : > { %v825_v57 = vadd.f32 %v819_v56, %v775_v10  ;;  %v1222_v58 = vpop.f32.mrb[17].mxu1 }
 0x7df   : > { %v822_v59 = vpop.f32.mrb[18].mxu1 }
 0x7e0   : > { %826 = vst.msk [vmem:[#allocation2] sm:$0xff] %vm295_vm0, %v825_v57  ;;  %v1223_v60 = vpop.f32.mrb[19].mxu1 }
 0x7e7   : > { %v937_v6 = vld [vmem:[#allocation2] sm:$0xff] }
 0x83a   : > { %v885_v61 = vpop.xlane.xlu1 %884 }
 0x83b   : > { %1340 = vrcp.f32 %v885_v61 }
 0x845   : > { %v1341_v62 = vpop.eup %1340 }
 0x881   : > { %v929_v63 = vpop.f32.mrb[20].mxu1 }
 0x882   : > { %v936_v1 = vmul.f32 %v1341_v62, %v929_v63  ;;  %v1234_v2 = vpop.f32.mrb[21].mxu1 }
 0x883   : > { %v932_v3 = vpop.f32.mrb[22].mxu1 }
 0x884   : > { %v938_v4 = vpack.c.bf16 %v936_v1, %v936_v1  ;;  %v1235_v5 = vpop.f32.mrb[23].mxu1 }
 0x886   : > { %1239 = vmatmul.mubr.msk.bf16.vlgmr.msra.gmra.mrb[24].mxu0 %vm344_vm3, %v938_v4 }
 0x959   : > { %v981_v7 = vpop.f32.mrb[24].mxu0 }
 0x95a   : > { %v987_v8 = vadd.f32 %v981_v7, %v937_v6  ;;  %v1240_v9 = vpop.f32.mrb[25].mxu0 }
 0x95b   : > { %v984_v11 = vpop.f32.mrb[26].mxu0 }
 0x95c   : > { %988 = vst.msk [vmem:[#allocation2] sm:$0xff] %vm295_vm0, %v987_v8  ;;  %v1241_v12 = vpop.f32.mrb[27].mxu0 }
 0x963   : > { %v989_v14 = vld [vmem:[#allocation2] sm:$0xff] }
 0x964   : > { %v997_v15 = vadd.f32 %v1130_v13, %v989_v14 }
 0x966   : > { %998 = vst.msk [vmem:[%s268_s8] sm:$0xff] %vm295_vm0, %v997_v15 }
 0x967   : > { %1441 = shalt.err (!%p1438_p2)
}
 0x968   : > { %s1442_s12 = scalar_lea.hbm %s1837_s7, 128  ;;  %s1446_s29 = scalar_lea.hbm %s1887_s5, 256 }
 0x969   : > { %p1443_p13 = scmp.ne.s32.totalorder %s1837_s7, %s1442_s12  ;;  %p1447_p4 = scmp.lt.u32.totalorder %s1837_s7, %s1887_s5 }
 0x96a   : > { %p1448_p5 = scmp.lt.u32.totalorder %s1446_s29, %s1442_s12  ;;  %p1450_p11 = scmp.lt.u32.totalorder %s1442_s12, %s1837_s7 }
 0x96b   : > { %p1444_p6 = pnand %p1443_p13, %p1901_p0 }
 0x96c   : > { %p1449_p8 = por %p1448_p5, %p1447_p4 }
 0x96d   : > { %p1445_p10 = pneg %p1444_p6 }
 0x96e   : > { %p1451_p1 = por %p1450_p11, %p1449_p8 }
 0x970   : > { %p1452_p3 = pnand %p1451_p1, %p1445_p10 }
 0x972   : > { %1455 = shalt.err (!%p1452_p3)
}
 0x973   : > { %1252 = dma.vmem_to_hbm [thread:$0]  (%p1901_p0), %s1839_s10, 128, %s1837_s7, %s1000_s6  }
 0x974 PF: > { %s1025_s26 = sand.u32 1, %s1486_s18   ;;  %p1902_p7 = scmp.ne.s32.totalorder %s1892_s25, 0 }
 0x975   : > { %p1903_p9 = scmp.ge.s32.totalorder %s1498_s21, 2  ;;  %s1026_s8 = scalar_lea.sflag [#allocation5], %s1025_s26 }
 0x977   : > { %p1266_p12 = pnand %p1903_p9, %p1902_p7 }
 0x979   : > { %1481 = dma.done.wait (!%p1266_p12), %s1026_s8, 128  }
 0x97a   : > { %1483 = vsyncadd (!%p1266_p12), %s1026_s8, 4294967168  ;;  %p19_p2 = scmp.ge.s32.totalorder %s1659_s14, 4   ;;  %s1904_s18 = smov %s1490_s19 }
 0x97b   : > { %s1905_s19 = smov %s1494_s20  ;;  %s1906_s20 = smov %s1675_s27 }
 0x97c   : > { %s1907_s21 = smov %s1659_s14  ;;  %21 = sbr.rel (!%p19_p2) target bundleno = 6 (0x6), region = 96 }
 0x983   :  { %1031 = vsyncpa [#allocation4], 1 }
 0x984   :  { %1033 = vsyncpa [#allocation4 + $0x1], 1 }
 0x985   :  { %1034 = vsyncpa [#allocation7], 1 }
 0x986   :  { %1035 = vsyncpa [#allocation5], 1 }
 0x987   :  { %1037 = vsyncpa [#allocation5 + $0x1], 1 }

</bundles_post_ra>
